<compile_context>
chip_gen: v5e
topology: v5e:2x2
jax: 0.10.0
libtpu: 0.0.40
codegen_flags: <defaults>
</compile_context>

<pallas_src>
import functools

import jax
import jax.numpy as jnp
from jax import lax
from jax.experimental import pallas as pl
from jax.experimental.pallas import tpu as pltpu

EPS = 1e-5


# -----------------------------------------------------------------------------
# Fused kernel: 3x3 conv (pad=1) -> BN (scale/shift) -> LeakyReLU -> dense concat
# -----------------------------------------------------------------------------
def _conv_bn_lrelu_kernel(x_ref, scale_ref, shift_ref, wk_ref, o_ref,
                          unf_ref, *, th, include_x, alpha):
    # x_ref   : (1, H, W, Cin)   f32  full image of the current batch element
    # scale_ref, shift_ref : (1, Cg) f32  folded BatchNorm scale / shift
    # wk_ref  : (3, 3*Cin, Cg)   bf16 conv weight, kj taps folded into K
    # o_ref   : (1, th, W, Cout) f32  output tile (Cout = Cin + Cg or Cg)
    # unf_ref : (H+2, W, 3*Cin)  bf16 scratch: zero-padded, kj-unfolded image
    h = pl.program_id(1)
    _, H, W, Cin = x_ref.shape
    Cg = wk_ref.shape[2]

    # Build the kj-unfolded, zero-padded activation once per image; all H-tiles
    # of this batch element reuse it.  unf[r, c, kj*Cin + ci] = x_pad[r, c+kj, ci].
    @pl.when(h == 0)
    def _build_unfolded_image():
        dt = unf_ref.dtype
        x_img = x_ref[0].astype(dt)                              # (H, W, Cin)
        # zero only the halo (top/bottom rows + left/right tap borders); the
        # interior is fully overwritten below, never redundantly zero-filled.
        zrow = jnp.zeros((1, W, 3 * Cin), dt)
        unf_ref[0:1, :, :] = zrow                                # top halo row
        unf_ref[H + 1:H + 2, :, :] = zrow                        # bottom halo row
        zcol = jnp.zeros((H, 1, Cin), dt)
        unf_ref[1:H + 1, 0:1, 0:Cin] = zcol                      # kj=0 tap, c=0
        unf_ref[1:H + 1, W - 1:W, 2 * Cin:3 * Cin] = zcol        # kj=2 tap, c=W-1
        # the three kj taps, written at lane offsets kj*Cin
        unf_ref[1:H + 1, 1:W, 0:Cin] = x_img[:, 0:W - 1, :]      # kj = 0
        unf_ref[1:H + 1, :, Cin:2 * Cin] = x_img                 # kj = 1
        unf_ref[1:H + 1, 0:W - 1, 2 * Cin:3 * Cin] = x_img[:, 1:W, :]  # kj = 2

    # 3x3 conv for this tile: 3 MXU matmuls with K = 3*Cin (one per ki tap),
    # accumulated in f32 registers (no VMEM accumulator round-trip).
    r0 = pl.multiple_of(h * th, th)              # first output row of this tile
    acc = None
    for ki in range(3):
        a = unf_ref[pl.ds(r0 + ki, th), :, :].reshape(th * W, 3 * Cin)
        part = jnp.dot(a, wk_ref[ki], preferred_element_type=jnp.float32)
        acc = part if acc is None else acc + part

    # Fused inference BatchNorm (scale/shift) + LeakyReLU.
    y = acc * scale_ref[...] + shift_ref[...]                    # (th*W, Cg) f32
    y = jnp.where(y >= 0, y, alpha * y)
    y = y.reshape(1, th, W, Cg).astype(o_ref.dtype)

    if include_x:
        # dense concat fused into the output write (no separate XLA concat pass)
        o_ref[0:1, :, :, 0:Cin] = x_ref[0:1, pl.ds(r0, th), :, :].astype(o_ref.dtype)
        o_ref[0:1, :, :, Cin:Cin + Cg] = y
    else:
        o_ref[...] = y


def _pick_tile_h(H, W):
    # Large tiles amortize per-grid-step overhead; cap to keep the (th*W, 3*Cin)
    # LHS / (th, W, Cout) output tile VMEM-friendly.  Must divide H exactly.
    target = max(8, min(H, max(1, 4096 // max(W, 1)), 32))
    for t in range(min(target, H), 0, -1):
        if H % t == 0:
            return t
    return H


# -----------------------------------------------------------------------------
# Wrapper: PyTorch interface (NCHW in / NCHW out, torch parameter layouts)
# -----------------------------------------------------------------------------
def conv_bn_leaky_relu_for_dense(x_nchw, weight, gamma, beta, running_mean,
                                 running_var, *, is_final=False,
                                 negative_slope=0.01):
    N, Cin, H, W = x_nchw.shape
    Cg = weight.shape[0]                           # torch conv weight: (Cg, Cin, 3, 3)
    th = _pick_tile_h(H, W)                        # H-tile rows (divides H)

    x = jnp.transpose(x_nchw, (0, 2, 3, 1))        # NCHW -> NHWC (channels on lanes)

    # Fold inference BatchNorm into per-channel scale / shift (done once, outside
    # the kernel: no rsqrt / extra VPU ops per element in the hot loop).
    inv_std = lax.rsqrt(running_var + EPS)
    scale = (gamma * inv_std).reshape(1, Cg).astype(jnp.float32)
    shift = (beta - running_mean * gamma * inv_std).reshape(1, Cg).astype(jnp.float32)

    # (Cg, Cin, 3, 3) -> (ki, kj*Cin + ci, Cg): kj taps folded into the matmul K
    # dimension; fed to the MXU in bf16 with f32 accumulation.
    wk = jnp.transpose(weight, (2, 3, 1, 0)).reshape(3, 3 * Cin, Cg)
    wk = wk.astype(jnp.bfloat16)

    Cout = Cg if is_final else Cin + Cg
    kernel = functools.partial(_conv_bn_lrelu_kernel, th=th,
                               include_x=not is_final, alpha=negative_slope)

    out_nhwc = pl.pallas_call(
        kernel,
        out_shape=jax.ShapeDtypeStruct((N, H, W, Cout), x.dtype),
        grid=(N, H // th),
        in_specs=[
            pl.BlockSpec((1, H, W, Cin), lambda n, h: (n, 0, 0, 0)),
            pl.BlockSpec((1, Cg), lambda n, h: (0, 0)),
            pl.BlockSpec((1, Cg), lambda n, h: (0, 0)),
            pl.BlockSpec((3, 3 * Cin, Cg), lambda n, h: (0, 0, 0)),
        ],
        out_specs=pl.BlockSpec((1, th, W, Cout), lambda n, h: (n, h, 0, 0)),
        scratch_shapes=[
            pltpu.VMEM((H + 2, W, 3 * Cin), jnp.bfloat16),   # padded kj-unfolded image
        ],
        compiler_params=pltpu.CompilerParams(
            dimension_semantics=("parallel", "arbitrary"),
            vmem_limit_bytes=32 * 1024 * 1024,
        ),
    )(x, scale, shift, wk)

    return jnp.transpose(out_nhwc, (0, 3, 1, 2))   # NHWC -> NCHW


# -----------------------------------------------------------------------------
# Pure-JAX reference (for correctness check)
# -----------------------------------------------------------------------------
def _ref_forward(x_nchw, weight, gamma, beta, running_mean, running_var, *,
                 is_final=False, negative_slope=0.01, matmul_dtype=jnp.float32):
    x = jnp.transpose(x_nchw, (0, 2, 3, 1))
    w_hwio = jnp.transpose(weight, (2, 3, 1, 0))   # (3, 3, Cin, Cg)
    y = lax.conv_general_dilated(
        x.astype(matmul_dtype), w_hwio.astype(matmul_dtype),
        window_strides=(1, 1), padding=((1, 1), (1, 1)),
        dimension_numbers=("NHWC", "HWIO", "NHWC"),
        preferred_element_type=jnp.float32)
    scale = gamma * lax.rsqrt(running_var + EPS)
    shift = beta - running_mean * scale
    a = y * scale + shift
    out = jnp.where(a >= 0, a, negative_slope * a)
    if not is_final:
        out = jnp.concatenate([x, out], axis=-1)
    return jnp.transpose(out, (0, 3, 1, 2))


def _check(x, weight, gamma, beta, running_mean, running_var, *, is_final):
    N, Cin, H, W = x.shape
    Cg = weight.shape[0]
    out = conv_bn_leaky_relu_for_dense(
        x, weight, gamma, beta, running_mean, running_var, is_final=is_final)
    out = jax.block_until_ready(out)
    want_c = Cg if is_final else Cin + Cg
    assert out.shape == (N, want_c, H, W), out.shape

    # (a) reference with the same bf16 MXU feed / f32 accumulation:
    #     differences are accumulation order only -> tight tolerance.
    ref_b = jax.block_until_ready(_ref_forward(
        x, weight, gamma, beta, running_mean, running_var,
        is_final=is_final, matmul_dtype=jnp.bfloat16))
    err_b = float(jnp.max(jnp.abs(out - ref_b)))
    if err_b > 5e-3:
        raise AssertionError(
            f"mismatch vs bf16-matched reference (is_final={is_final}): {err_b}")

    # (b) full-f32 reference of the PyTorch module: tolerance covers the
    #     bf16 rounding of the MXU operands in the kernel.
    ref_f = jax.block_until_ready(_ref_forward(
        x, weight, gamma, beta, running_mean, running_var,
        is_final=is_final, matmul_dtype=jnp.float32))
    err_f = float(jnp.max(jnp.abs(out - ref_f)))
    if err_f > 5e-2:
        raise AssertionError(
            f"mismatch vs f32 reference (is_final={is_final}): {err_f}")


# -----------------------------------------------------------------------------
if __name__ == "__main__":
    key = jax.random.PRNGKey(0)

    def make_inputs(key, N, Cin, Cg, H, W):
        kx, kw, kg, kb, km, kv = jax.random.split(key, 6)
        x = jax.random.normal(kx, (N, Cin, H, W), jnp.float32)          # NCHW
        weight = 0.1 * jax.random.normal(kw, (Cg, Cin, 3, 3), jnp.float32)
        gamma = 1.0 + 0.1 * jax.random.normal(kg, (Cg,), jnp.float32)
        beta = 0.1 * jax.random.normal(kb, (Cg,), jnp.float32)
        mean = 0.1 * jax.random.normal(km, (Cg,), jnp.float32)
        var = 1.0 + 0.1 * jax.random.uniform(kv, (Cg,), jnp.float32)
        return x, weight, gamma, beta, mean, var

    # Primary demo shape (matches the module's small-size spec), both branches.
    k1, k2 = jax.random.split(key)
    args = make_inputs(k1, N=2, Cin=4, Cg=8, H=16, W=16)
    for is_final in (False, True):
        _check(*args, is_final=is_final)

    # Secondary shape that exercises the multi-H-tile path (th < H).
    args2 = make_inputs(k2, N=1, Cin=8, Cg=16, H=64, W=16)
    _check(*args2, is_final=False)

    print("KERNEL_OK")
</pallas_src>

<mosaic_0001>
module attributes {stable_mosaic.version = 11 : i64} {
  func.func @_conv_bn_lrelu_kernel(%arg0: i32, %arg1: i32, %arg2: memref<1x16x16x4xf32, #tpu.memory_space<vmem>>, %arg3: memref<1x8xf32, #tpu.memory_space<vmem>>, %arg4: memref<1x8xf32, #tpu.memory_space<vmem>>, %arg5: memref<3x12x8xbf16, #tpu.memory_space<vmem>>, %arg6: memref<1x16x16x12xf32, #tpu.memory_space<vmem>>, %arg7: memref<18x16x12xbf16, #tpu.memory_space<vmem>>) attributes {dimension_semantics = [#tpu.dimension_semantics<parallel>, #tpu.dimension_semantics<arbitrary>], iteration_bounds = array<i64: 2, 1>, scalar_prefetch = 0 : i64, scratch_operands = 1 : i64, tpu.core_type = #tpu.core_type<tc>, window_params = [{transform_indices = @transform_0, window_bounds = array<i64: 1, 16, 16, 4>}, {pipeline_mode = #tpu.pipeline_mode<synchronous>, transform_indices = @transform_1, window_bounds = array<i64: 1, 8>}, {pipeline_mode = #tpu.pipeline_mode<synchronous>, transform_indices = @transform_2, window_bounds = array<i64: 1, 8>}, {pipeline_mode = #tpu.pipeline_mode<synchronous>, transform_indices = @transform_3, window_bounds = array<i64: 3, 12, 8>}, {transform_indices = @transform_4, window_bounds = array<i64: 1, 16, 16, 12>}]} {
    %c0_i32 = arith.constant 0 : i32
    %0 = arith.cmpi eq, %arg1, %c0_i32 : i32
    %1 = arith.extui %0 : i1 to i32
    %c0_i32_0 = arith.constant 0 : i32
    %2 = arith.cmpi ne, %1, %c0_i32_0 : i32
    scf.if %2 {
      %c0_32 = arith.constant 0 : index
      %c0_33 = arith.constant 0 : index
      %c0_34 = arith.constant 0 : index
      %c0_35 = arith.constant 0 : index
      %44 = vector.load %arg2[%c0_32, %c0_33, %c0_34, %c0_35] : memref<1x16x16x4xf32, #tpu.memory_space<vmem>>, vector<1x16x16x4xf32>
      %45 = vector.shape_cast %44 : vector<1x16x16x4xf32> to vector<16x16x4xf32>
      %46 = arith.truncf %45 : vector<16x16x4xf32> to vector<16x16x4xbf16>
      %cst_36 = arith.constant 0.000000e+00 : bf16
      %47 = vector.broadcast %cst_36 : bf16 to vector<1x16x12xbf16>
      %c0_37 = arith.constant 0 : index
      %c0_38 = arith.constant 0 : index
      %c0_39 = arith.constant 0 : index
      %48 = vector.load %arg7[%c0_37, %c0_38, %c0_39] : memref<18x16x12xbf16, #tpu.memory_space<vmem>>, vector<1x16x12xbf16>
      tpu.vector_store %arg7[%c0_37, %c0_38, %c0_39], %47 {strides = array<i32>} : memref<18x16x12xbf16, #tpu.memory_space<vmem>>, vector<1x16x12xbf16>,
      %c17 = arith.constant 17 : index
      %c0_40 = arith.constant 0 : index
      %c0_41 = arith.constant 0 : index
      %49 = vector.load %arg7[%c17, %c0_40, %c0_41] : memref<18x16x12xbf16, #tpu.memory_space<vmem>>, vector<1x16x12xbf16>
      tpu.vector_store %arg7[%c17, %c0_40, %c0_41], %47 {strides = array<i32>} : memref<18x16x12xbf16, #tpu.memory_space<vmem>>, vector<1x16x12xbf16>,
      %cst_42 = arith.constant 0.000000e+00 : bf16
      %50 = vector.broadcast %cst_42 : bf16 to vector<16x1x4xbf16>
      %c1_43 = arith.constant 1 : index
      %c0_44 = arith.constant 0 : index
      %c0_45 = arith.constant 0 : index
      %51 = vector.load %arg7[%c1_43, %c0_44, %c0_45] : memref<18x16x12xbf16, #tpu.memory_space<vmem>>, vector<16x1x4xbf16>
      tpu.vector_store %arg7[%c1_43, %c0_44, %c0_45], %50 {strides = array<i32>} : memref<18x16x12xbf16, #tpu.memory_space<vmem>>, vector<16x1x4xbf16>,
      %c1_46 = arith.constant 1 : index
      %c15 = arith.constant 15 : index
      %c8 = arith.constant 8 : index
      %52 = vector.load %arg7[%c1_46, %c15, %c8] : memref<18x16x12xbf16, #tpu.memory_space<vmem>>, vector<16x1x4xbf16>
      tpu.vector_store %arg7[%c1_46, %c15, %c8], %50 {strides = array<i32>} : memref<18x16x12xbf16, #tpu.memory_space<vmem>>, vector<16x1x4xbf16>,
      %53 = vector.extract_strided_slice %46 {offsets = [0, 0, 0], sizes = [16, 15, 4], strides = [1, 1, 1]} : vector<16x16x4xbf16> to vector<16x15x4xbf16>
      %c1_47 = arith.constant 1 : index
      %c1_48 = arith.constant 1 : index
      %c0_49 = arith.constant 0 : index
      %54 = vector.load %arg7[%c1_47, %c1_48, %c0_49] : memref<18x16x12xbf16, #tpu.memory_space<vmem>>, vector<16x15x4xbf16>
      tpu.vector_store %arg7[%c1_47, %c1_48, %c0_49], %53 {strides = array<i32>} : memref<18x16x12xbf16, #tpu.memory_space<vmem>>, vector<16x15x4xbf16>,
      %c1_50 = arith.constant 1 : index
      %c0_51 = arith.constant 0 : index
      %c4_52 = arith.constant 4 : index
      %55 = vector.load %arg7[%c1_50, %c0_51, %c4_52] : memref<18x16x12xbf16, #tpu.memory_space<vmem>>, vector<16x16x4xbf16>
      tpu.vector_store %arg7[%c1_50, %c0_51, %c4_52], %46 {strides = array<i32>} : memref<18x16x12xbf16, #tpu.memory_space<vmem>>, vector<16x16x4xbf16>,
      %56 = vector.extract_strided_slice %46 {offsets = [0, 1, 0], sizes = [16, 15, 4], strides = [1, 1, 1]} : vector<16x16x4xbf16> to vector<16x15x4xbf16>
      %c1_53 = arith.constant 1 : index
      %c0_54 = arith.constant 0 : index
      %c8_55 = arith.constant 8 : index
      %57 = vector.load %arg7[%c1_53, %c0_54, %c8_55] : memref<18x16x12xbf16, #tpu.memory_space<vmem>>, vector<16x15x4xbf16>
      tpu.vector_store %arg7[%c1_53, %c0_54, %c8_55], %56 {strides = array<i32>} : memref<18x16x12xbf16, #tpu.memory_space<vmem>>, vector<16x15x4xbf16>,
    } else {
    }
    %c16_i32 = arith.constant 16 : i32
    %3 = arith.muli %arg1, %c16_i32 : i32
    %4 = tpu.assume_multiple %3, 16 : i32
    %c0_i32_1 = arith.constant 0 : i32
    %5 = arith.addi %4, %c0_i32_1 : i32
    %6 = arith.index_cast %5 : i32 to index
    %c0 = arith.constant 0 : index
    %c0_2 = arith.constant 0 : index
    %7 = vector.load %arg7[%6, %c0, %c0_2] : memref<18x16x12xbf16, #tpu.memory_space<vmem>>, vector<16x16x12xbf16>
    %8 = vector.shape_cast %7 : vector<16x16x12xbf16> to vector<256x12xbf16>
    %c0_3 = arith.constant 0 : index
    %c0_4 = arith.constant 0 : index
    %c0_5 = arith.constant 0 : index
    %9 = vector.load %arg5[%c0_3, %c0_4, %c0_5] : memref<3x12x8xbf16, #tpu.memory_space<vmem>>, vector<1x12x8xbf16>
    %10 = vector.shape_cast %9 : vector<1x12x8xbf16> to vector<12x8xbf16>
    %cst = arith.constant dense<0.000000e+00> : vector<256x8xf32>
    %11 = tpu.matmul %8, %10, %cst {dimension_numbers = #tpu.dot_dimension_numbers<[1], [0], [0], [1], [0, 0, 1, 1], [], []>} : vector<256x12xbf16>, vector<12x8xbf16>, vector<256x8xf32> -> vector<256x8xf32>
    %c1_i32 = arith.constant 1 : i32
    %12 = arith.addi %4, %c1_i32 : i32
    %13 = arith.index_cast %12 : i32 to index
    %c0_6 = arith.constant 0 : index
    %c0_7 = arith.constant 0 : index
    %14 = vector.load %arg7[%13, %c0_6, %c0_7] : memref<18x16x12xbf16, #tpu.memory_space<vmem>>, vector<16x16x12xbf16>
    %15 = vector.shape_cast %14 : vector<16x16x12xbf16> to vector<256x12xbf16>
    %c1 = arith.constant 1 : index
    %c0_8 = arith.constant 0 : index
    %c0_9 = arith.constant 0 : index
    %16 = vector.load %arg5[%c1, %c0_8, %c0_9] : memref<3x12x8xbf16, #tpu.memory_space<vmem>>, vector<1x12x8xbf16>
    %17 = vector.shape_cast %16 : vector<1x12x8xbf16> to vector<12x8xbf16>
    %cst_10 = arith.constant dense<0.000000e+00> : vector<256x8xf32>
    %18 = tpu.matmul %15, %17, %cst_10 {dimension_numbers = #tpu.dot_dimension_numbers<[1], [0], [0], [1], [0, 0, 1, 1], [], []>} : vector<256x12xbf16>, vector<12x8xbf16>, vector<256x8xf32> -> vector<256x8xf32>
    %19 = arith.addf %11, %18 : vector<256x8xf32>
    %c2_i32 = arith.constant 2 : i32
    %20 = arith.addi %4, %c2_i32 : i32
    %21 = arith.index_cast %20 : i32 to index
    %c0_11 = arith.constant 0 : index
    %c0_12 = arith.constant 0 : index
    %22 = vector.load %arg7[%21, %c0_11, %c0_12] : memref<18x16x12xbf16, #tpu.memory_space<vmem>>, vector<16x16x12xbf16>
    %23 = vector.shape_cast %22 : vector<16x16x12xbf16> to vector<256x12xbf16>
    %c2 = arith.constant 2 : index
    %c0_13 = arith.constant 0 : index
    %c0_14 = arith.constant 0 : index
    %24 = vector.load %arg5[%c2, %c0_13, %c0_14] : memref<3x12x8xbf16, #tpu.memory_space<vmem>>, vector<1x12x8xbf16>
    %25 = vector.shape_cast %24 : vector<1x12x8xbf16> to vector<12x8xbf16>
    %cst_15 = arith.constant dense<0.000000e+00> : vector<256x8xf32>
    %26 = tpu.matmul %23, %25, %cst_15 {dimension_numbers = #tpu.dot_dimension_numbers<[1], [0], [0], [1], [0, 0, 1, 1], [], []>} : vector<256x12xbf16>, vector<12x8xbf16>, vector<256x8xf32> -> vector<256x8xf32>
    %27 = arith.addf %19, %26 : vector<256x8xf32>
    %c0_16 = arith.constant 0 : index
    %c0_17 = arith.constant 0 : index
    %28 = vector.load %arg3[%c0_16, %c0_17] : memref<1x8xf32, #tpu.memory_space<vmem>>, vector<1x8xf32>
    %29 = vector.broadcast %28 : vector<1x8xf32> to vector<256x8xf32>
    %30 = arith.mulf %27, %29 : vector<256x8xf32>
    %c0_18 = arith.constant 0 : index
    %c0_19 = arith.constant 0 : index
    %31 = vector.load %arg4[%c0_18, %c0_19] : memref<1x8xf32, #tpu.memory_space<vmem>>, vector<1x8xf32>
    %32 = vector.broadcast %31 : vector<1x8xf32> to vector<256x8xf32>
    %33 = arith.addf %30, %32 : vector<256x8xf32>
    %cst_20 = arith.constant 0.000000e+00 : f32
    %34 = vector.broadcast %cst_20 : f32 to vector<256x8xf32>
    %35 = arith.cmpf oge, %33, %34 : vector<256x8xf32>
    %cst_21 = arith.constant 0.00999999977 : f32
    %36 = vector.broadcast %cst_21 : f32 to vector<256x8xf32>
    %37 = arith.mulf %36, %33 : vector<256x8xf32>
    %38 = arith.select %35, %33, %37 : vector<256x8xi1>, vector<256x8xf32>
    %39 = vector.shape_cast %38 : vector<256x8xf32> to vector<1x16x16x8xf32>
    %c0_22 = arith.constant 0 : index
    %40 = arith.index_cast %4 : i32 to index
    %c0_23 = arith.constant 0 : index
    %c0_24 = arith.constant 0 : index
    %41 = vector.load %arg2[%c0_22, %40, %c0_23, %c0_24] : memref<1x16x16x4xf32, #tpu.memory_space<vmem>>, vector<1x16x16x4xf32>
    %c0_25 = arith.constant 0 : index
    %c0_26 = arith.constant 0 : index
    %c0_27 = arith.constant 0 : index
    %c0_28 = arith.constant 0 : index
    %42 = vector.load %arg6[%c0_25, %c0_26, %c0_27, %c0_28] : memref<1x16x16x12xf32, #tpu.memory_space<vmem>>, vector<1x16x16x4xf32>
    tpu.vector_store %arg6[%c0_25, %c0_26, %c0_27, %c0_28], %41 {strides = array<i32>} : memref<1x16x16x12xf32, #tpu.memory_space<vmem>>, vector<1x16x16x4xf32>,
    %c0_29 = arith.constant 0 : index
    %c0_30 = arith.constant 0 : index
    %c0_31 = arith.constant 0 : index
    %c4 = arith.constant 4 : index
    %43 = vector.load %arg6[%c0_29, %c0_30, %c0_31, %c4] : memref<1x16x16x12xf32, #tpu.memory_space<vmem>>, vector<1x16x16x8xf32>
    tpu.vector_store %arg6[%c0_29, %c0_30, %c0_31, %c4], %39 {strides = array<i32>} : memref<1x16x16x12xf32, #tpu.memory_space<vmem>>, vector<1x16x16x8xf32>,
    return
  }
  func.func @transform_0(%arg0: i32, %arg1: i32) -> (i32, i32, i32, i32) {
    %c0_i32 = arith.constant 0 : i32
    %c0_i32_0 = arith.constant 0 : i32
    %c0_i32_1 = arith.constant 0 : i32
    %c0_i32_2 = arith.constant 0 : i32
    return %arg0, %c0_i32, %c0_i32_0, %c0_i32_1 : i32, i32, i32, i32
  }
  func.func @transform_1(%arg0: i32, %arg1: i32) -> (i32, i32) {
    %c0_i32 = arith.constant 0 : i32
    %c0_i32_0 = arith.constant 0 : i32
    %c0_i32_1 = arith.constant 0 : i32
    return %c0_i32, %c0_i32_0 : i32, i32
  }
  func.func @transform_2(%arg0: i32, %arg1: i32) -> (i32, i32) {
    %c0_i32 = arith.constant 0 : i32
    %c0_i32_0 = arith.constant 0 : i32
    %c0_i32_1 = arith.constant 0 : i32
    return %c0_i32, %c0_i32_0 : i32, i32
  }
  func.func @transform_3(%arg0: i32, %arg1: i32) -> (i32, i32, i32) {
    %c0_i32 = arith.constant 0 : i32
    %c0_i32_0 = arith.constant 0 : i32
    %c0_i32_1 = arith.constant 0 : i32
    %c0_i32_2 = arith.constant 0 : i32
    return %c0_i32, %c0_i32_0, %c0_i32_1 : i32, i32, i32
  }
  func.func @transform_4(%arg0: i32, %arg1: i32) -> (i32, i32, i32, i32) {
    %c0_i32 = arith.constant 0 : i32
    %c0_i32_0 = arith.constant 0 : i32
    %c0_i32_1 = arith.constant 0 : i32
    return %arg0, %arg1, %c0_i32, %c0_i32_0 : i32, i32, i32, i32
  }
}

</mosaic_0001>

<bundles_post_ra>
// kernel: tpu_custom_call.1
= control target key start
LH: loop header
LB: loop body
LE: loop exit
PB: predicated region body
PF: predicated region fallthrough
CT: control target
= control target key end

     0   :  { %s3018_s15 = smov 0   ;;  %s3020_s16 = smov 0   ;;  %s4202_s0 = inlined_call_operand.vmem [shape: f32[2,16,16,4], index: 0, kind: input, shape index: {}]   ;;  %s4203_s1 = inlined_call_operand.vmem [shape: f32[1,8], index: 1, kind: input, shape index: {}]   ;;  %s4204_s2 = inlined_call_operand.vmem [shape: f32[1,8], index: 2, kind: input, shape index: {}]   ;;  %s4205_s3 = inlined_call_operand.vmem [shape: bf16[3,12,8], index: 3, kind: input, shape index: {}]   ;;  %s4206_s4 = inlined_call_operand.vmem [shape: f32[2,16,16,12], index: 4, kind: output, shape index: {}]  }
   0x1   :  { %s3022_s17 = smov 0  }
   0x2 LB: > { %s26_s18 = sadd.s32 1, %s2984_s16  ;;  %p2554_p0 = scmp.ge.s32.totalorder %s2988_s17, 1  ;;  %s2988_s17 = sphi %s3022_s17, %s14_s17   ;;  %s2984_s16 = sphi %s3020_s16, %s4220_s16   ;;  %s2980_s15 = sphi %s3018_s15, %s4219_s15  }
   0x3   : > { %p28_p1 = scmp.ge.s32.totalorder %s26_s18, 2  ;;  %p176_p2 = scmp.lt.s32.totalorder %s2988_s17, 3 }
   0x5   : > { %s4222_s18 = smov (%p28_p1, %s26_s18), 0  ;;  %p177_p3 = pnand %p2554_p0, %p176_p2 }
   0x6   : > { %p207_p4 = scmp.lt.s32.totalorder (!%p177_p3), %s2980_s15, 1  ;;  %s2990_s23 = smov (!%p177_p3), 4  }
   0x7   : > { %180 = sbr.rel (%p177_p3) target bundleno = 641 (0x281), region = 36  ;;  %s2991_s24 = smov (!%p177_p3), 8  }
   0xc   : > { %s4224_s15 = smov (!%p207_p4, %s2980_s15), 1  ;;  %vm920_vm0 = vsmask.f32 3328  ;;  %vm921_vm1 = vsmask.f32 7440  ;;  %vm299_vm3 = vcmask 24576  }
   0xd   : > { %s2881_s19 = sshll.u32 %s4224_s15, 8  ;;  %vm3079_vm2 = vmor %vm920_vm0, %vm921_vm1  ;;  %vm300_vm4 = vsmask.f32 256  ;;  %vm350_vm6 = vcmask 93251   ;;  %vm351_vm7 = vsmask.f32 7950 }
   0xe   : > { %s3044_s22 = scalar_lea.vmem %s4202_s0, %s2881_s19  ;;  %vm3277_vm5 = vmand %vm299_vm3, %vm300_vm4  ;;  %vm401_vm9 = vsmask.f32 4368  ;;  %vm691_vm10 = vcmask 27648   ;;  %vm692_vm12 = vsmask.f32 7938  ;;  %vm887_vm14 = vcmask 60448  }
   0xf   : > { %v231_v0 = vld [vmem:[%s3044_s22 + $0x18] sm:$0xff]  ;;  %v229_v1 = vld [vmem:[%s3044_s22 + $0x8] sm:$0xff]  ;;  %v230_v6 = vld [vmem:[%s3044_s22 + $0x10] sm:$0xff]  ;;  %vm292_vm15 = vcmask 93184   ;;  %vm1441_vm1 = vcmask 1045504   ;;  %vm1392_vm3 = vcmask 97280  }
  0x10   : > { %v253_v2 = vld [vmem:[%s3044_s22 + $0xc8] sm:$0xff]  ;;  %v263_v3 = vpack.c.bf16 %v231_v0, %v231_v0  ;;  %v261_v4 = vpack.c.bf16 %v229_v1, %v229_v1  ;;  %v252_v7 = vld [vmem:[%s3044_s22 + $0xc0] sm:$0xff]  ;;  %v262_v8 = vpack.c.bf16 %v230_v6, %v230_v6  ;;  %v254_v35 = vld [vmem:[%s3044_s22 + $0xd0] sm:$0xff] }
  0x11   : > { %v285_v5 = vpack.c.bf16 %v253_v2, %v253_v2  ;;  %v284_v9 = vpack.c.bf16 %v252_v7, %v252_v7  ;;  %v228_v29 = vld [vmem:[%s3044_s22] sm:$0xff]  ;;  %v233_v34 = vld [vmem:[%s3044_s22 + $0x28] sm:$0xff]  ;;  %v3085_v46 = vpack.c.bf16 %v254_v35, %v254_v35  ;;  %vm3286_vm8 = vmand %vm350_vm6, %vm351_vm7 }
  0x12   : > { %797 = vrot.lane.b32.xlu0 %v263_v3, %s2990_s23  ;;  %793 = vrot.lane.b32.xlu1 %v261_v4, %s2990_s23  ;;  %v420_v12 = vshrl.u32 %v262_v8, 16  ;;  %v423_v13 = vshll.u32 %v262_v8, 16  ;;  %v431_v24 = vshll.u32 %v263_v3, 16  ;;  %v412_v25 = vshrl.u32 %v261_v4, 16  ;;  %v232_v48 = vld [vmem:[%s3044_s22 + $0x20] sm:$0xff]  ;;  %vm3303_vm11 = vmor %vm300_vm4, %vm401_vm9 }
  0x13   : > { %v604_v10 = vshrl.u32 %v285_v5, 16  ;;  %v607_v11 = vshll.u32 %v285_v5, 16  ;;  %839 = vrot.lane.b32.xlu2 %v284_v9, %s2990_s23  ;;  %v596_v14 = vshrl.u32 %v284_v9, 16  ;;  %v599_v18 = vshll.u32 %v284_v9, 16  ;;  %vm3330_vm13 = vmand %vm691_vm10, %vm692_vm12  ;;  %v386_v43 = vld [vmem:[#allocation2 + $0x64] sm:$0x8] }
  0x14   : > { %v3056_v19 = vrot.slane %v420_v12, 7  ;;  %v932_v20 = vrot.slane %v420_v12, 4  ;;  %v933_v21 = vrot.slane %v423_v13, 5  ;;  %v415_v30 = vshll.u32 %v261_v4, 16 }
  0x15   : > { %v606_v15 = vrot.slane %v604_v10, 7  ;;  %v3054_v16 = vrot.slane %v607_v11, 5  ;;  %v1037_v17 = vrot.slane %v604_v10, 4  ;;  %v3058_v22 = vrot.slane %v596_v14, 7 }
  0x16   : > { %v3063_v26 = vor.u32 %v423_v13, %v3056_v19  ;;  %v934_v27 = vor.u32 %v933_v21, %v932_v20  ;;  %v414_v31 = vrot.slane %v412_v25, 7  ;;  %v428_v33 = vshrl.u32 %v263_v3, 16 }
  0x17   : > { %v3060_v23 = vor.u32 %v607_v11, %v606_v15  ;;  %v3066_v28 = vor.u32 %v599_v18, %v3058_v22  ;;  %v1038_v32 = vor.u32 %v1037_v17, %v3054_v16  ;;  %v936_v36 = vrot.slane %v431_v24, 5 }
  0x18   : > { %v3074_v37 = vor.u32 %v415_v30, %v414_v31  ;;  %v3076_v38 = vpack.c.bf16 %v228_v29, %v228_v29  ;;  %v935_v39 = vrot.slane %v934_v27, 4  ;;  %v938_v40 = vrot.slane %v428_v33, 4 }
  0x19   : > { %v430_v41 = vrot.slane %v428_v33, 7  ;;  %v1031_v42 = vrot.slane %v596_v14, 4  ;;  %v929_v44 = vrot.slane %v412_v25, 4  ;;  %v3083_v45 = vpack.c.bf16 %v233_v34, %v233_v34  ;;  %v235_v25 = vld [vmem:[%s3044_s22 + $0x38] sm:$0xff] }
  0x1a   : > { %841 = vrot.lane.b32.xlu0 %v285_v5, %s2990_s23  ;;  %795 = vrot.lane.b32.xlu1 %v262_v8, %s2990_s23  ;;  %v1032_v47 = vrot.slane %v599_v18, 5  ;;  %v1039_v49 = vrot.slane %v1038_v32, 4  ;;  %v927_v50 = vrot.slane %v415_v30, 5  ;;  %v939_v51 = vor.u32 %v938_v40, %v936_v36  ;;  %v234_v5 = vld [vmem:[%s3044_s22 + $0x30] sm:$0xff]  ;;  %v257_v18 = vld [vmem:[%s3044_s22 + $0xe8] sm:$0xff] }
  0x1b   : > { %v3088_v52 = vor.u32 %v431_v24, %v430_v41  ;;  %v404_v53 = vshrl.u32 %v3076_v38, 16  ;;  %v407_v54 = vshll.u32 %v3076_v38, 16  ;;  %v444_v55 = vshrl.u32 %v3083_v45, 16 }
  0x1c   : > { %v612_v56 = vshrl.u32 %v3085_v46, 16  ;;  %v937_v57 = vsel %vm3079_vm2, %v935_v39, %v936_v36  ;;  %v940_v58 = vrot.slane %v939_v51, 4  ;;  %v1033_v59 = vor.u32 %v1032_v47, %v1031_v42 }
  0x1d   : > { %v3096_v60 = vpack.c.bf16 %v232_v48, %v232_v48  ;;  %v446_v61 = vrot.slane %v444_v55, 7  ;;  %v447_v62 = vshll.u32 %v3083_v45, 16  ;;  %v615_v0 = vshll.u32 %v3085_v46, 16 }
  0x1e   : > { %v3099_v63 = vrot.slane %v612_v56, 7  ;;  %1073 = vrot.lane.b32.xlu2 %v940_v58, %s2991_s24  ;;  %v930_v1 = vor.u32 %v929_v44, %v927_v50  ;;  %v1034_v4 = vrot.slane %v1033_v59, 4  ;;  %v923_v7 = vrot.slane %v404_v53, 4 }
  0x1f   : > { %v3105_v2 = vor.u32 %v447_v62, %v446_v61  ;;  %v436_v6 = vshrl.u32 %v3096_v60, 16  ;;  %v924_v8 = vrot.slane %v407_v54, 5  ;;  %v3116_v9 = vpack.c.bf16 %v234_v5, %v234_v5 }
  0x20   : > { %v3108_v3 = vor.u32 %v615_v0, %v3099_v63  ;;  %v439_v11 = vshll.u32 %v3096_v60, 16  ;;  %v931_v12 = vrot.slane %v930_v1, 4  ;;  %v1036_v13 = vsel %vm3079_vm2, %v1034_v4, %v3054_v16  ;;  %v255_v16 = vld [vmem:[%s3044_s22 + $0xd8] sm:$0xff] }
  0x21   : > { %v3118_v10 = vrot.slane %v436_v6, 7  ;;  %v925_v14 = vor.u32 %v924_v8, %v923_v7  ;;  %v452_v15 = vshrl.u32 %v3116_v9, 16  ;;  %v455_v21 = vshll.u32 %v3116_v9, 16 }
  0x22   : > { %1117 = vrot.lane.b32.xlu0 %v1039_v49, %s2991_s24  ;;  %1071 = vrot.lane.b32.xlu1 %v937_v57, %s2991_s24  ;;  %v3134_v24 = vpack.c.bf16 %v257_v18, %v257_v18  ;;  %v3149_v33 = vpack.c.bf16 %v235_v25, %v235_v25  ;;  %v287_v34 = vpack.c.bf16 %v255_v16, %v255_v16  ;;  %v945_v35 = vrot.slane %v447_v62, 5  ;;  %v256_v49 = vld [vmem:[%s3044_s22 + $0xe0] sm:$0xff] }
  0x23   : > { %v3126_v17 = vor.u32 %v439_v11, %v3118_v10  ;;  %v3131_v20 = vrot.slane %v452_v15, 7  ;;  %v926_v27 = vrot.slane %v925_v14, 4  ;;  %v947_v36 = vrot.slane %v444_v55, 4 }
  0x24   : > { %v636_v30 = vshrl.u32 %v3134_v24, 16  ;;  %v639_v32 = vshll.u32 %v3134_v24, 16  ;;  %v460_v41 = vshrl.u32 %v3149_v33, 16  ;;  %v620_v42 = vshrl.u32 %v287_v34, 16 }
  0x25   : > { %v3145_v29 = vor.u32 %v455_v21, %v3131_v20  ;;  %v928_v39 = vsel %vm3079_vm2, %v926_v27, %v927_v50  ;;  %v623_v44 = vshll.u32 %v287_v34, 16  ;;  %v1040_v47 = vrot.slane %v612_v56, 4 }
  0x26   : > { %1115 = vrot.lane.b32.xlu2 %v1036_v13, %s2991_s24  ;;  %v638_v31 = vrot.slane %v636_v30, 7  ;;  %v1041_v48 = vrot.slane %v615_v0, 5  ;;  %v948_v51 = vor.u32 %v947_v36, %v945_v35  ;;  %v462_v55 = vrot.slane %v460_v41, 7  ;;  %v258_v13 = vld [vmem:[%s3044_s22 + $0xf0] sm:$0xff] }
  0x27   : > { %v463_v50 = vshll.u32 %v3149_v33, 16  ;;  %v622_v57 = vrot.slane %v620_v42, 7  ;;  %v941_v58 = vrot.slane %v436_v6, 4  ;;  %v942_v59 = vrot.slane %v439_v11, 5 }
  0x28   : > { %v3153_v40 = vor.u32 %v639_v32, %v638_v31  ;;  %v288_v62 = vpack.c.bf16 %v256_v49, %v256_v49  ;;  %v1046_v0 = vrot.slane %v620_v42, 4  ;;  %v949_v1 = vrot.slane %v948_v51, 4  ;;  %v236_v31 = vld [vmem:[%s3044_s22 + $0x40] sm:$0xff] }
  0x29   : > { %v3162_v61 = vor.u32 %v463_v50, %v462_v55  ;;  %v3164_v56 = vor.u32 %v623_v44, %v622_v57  ;;  %v1042_v4 = vor.u32 %v1041_v48, %v1040_v47  ;;  %v1044_v5 = vrot.slane %v623_v44, 5  ;;  %v259_v47 = vld [vmem:[%s3044_s22 + $0xf8] sm:$0xff] }
  0x2a   : > { %1069 = vrot.lane.b32.xlu1 %v931_v12, %s2991_s24  ;;  %791 = vrot.lane.b32.xlu0 %v3076_v38, %s2990_s23  ;;  %v943_v7 = vor.u32 %v942_v59, %v941_v58  ;;  %v631_v12 = vshll.u32 %v288_v62, 16  ;;  %v3174_v18 = vpack.c.bf16 %v258_v13, %v258_v13  ;;  %v1055_v49 = vrot.slane %v636_v30, 4 }
  0x2b   : > { %v1047_v8 = vor.u32 %v1046_v0, %v1044_v5  ;;  %v1043_v6 = vrot.slane %v1042_v4, 4  ;;  %v3205_v51 = vpack.c.bf16 %v259_v47, %v259_v47  ;;  %v1053_v55 = vrot.slane %v639_v32, 5  ;;  %v250_v47 = vld [vmem:[%s3044_s22 + $0xb0] sm:$0xff] }
  0x2c   : > { %v944_v14 = vrot.slane %v943_v7, 4  ;;  %v647_v36 = vshll.u32 %v3174_v18, 16  ;;  %v954_v57 = vrot.slane %v463_v50, 5  ;;  %v956_v58 = vrot.slane %v460_v41, 4 }
  0x2d   : > { %v1048_v16 = vrot.slane %v1047_v8, 4  ;;  %v1045_v27 = vsel %vm3079_vm2, %v1043_v6, %v1044_v5  ;;  %v652_v0 = vshrl.u32 %v3205_v51, 16  ;;  %v655_v32 = vshll.u32 %v3205_v51, 16 }
  0x2e   : > { %1067 = vrot.lane.b32.xlu2 %v928_v39, %s2991_s24  ;;  %v3190_v39 = vpack.c.bf16 %v236_v31, %v236_v31  ;;  %v957_v4 = vor.u32 %v956_v58, %v954_v57  ;;  %v950_v41 = vrot.slane %v452_v15, 4  ;;  %v951_v50 = vrot.slane %v455_v21, 5  ;;  %v237_v21 = vld [vmem:[%s3044_s22 + $0x48] sm:$0xff] }
  0x2f   : > { %v654_v30 = vrot.slane %v652_v0, 7  ;;  %v1050_v7 = vrot.slane %v631_v12, 5  ;;  %v269_v31 = vpack.c.bf16 %v237_v21, %v237_v21  ;;  %v3244_v58 = vpack.c.bf16 %v250_v47, %v250_v47 }
  0x30   : > { %v468_v44 = vshrl.u32 %v3190_v39, 16  ;;  %v471_v48 = vshll.u32 %v3190_v39, 16  ;;  %v958_v6 = vrot.slane %v957_v4, 4  ;;  %v952_v13 = vor.u32 %v951_v50, %v950_v41 }
  0x31   : > { %v3222_v8 = vor.u32 %v655_v32, %v654_v30  ;;  %v580_v4 = vshrl.u32 %v3244_v58, 16  ;;  %v238_v30 = vld [vmem:[%s3044_s22 + $0x50] sm:$0xff]  ;;  %v3251_v41 = vrot.slane %v404_v53, 7  ;;  %vm1163_vm4 = vcmask 93248  }
  0x32   : > { %845 = vrot.lane.b32.xlu1 %v287_v34, %s2990_s23  ;;  %801 = vrot.lane.b32.xlu0 %v3083_v45, %s2990_s23  ;;  %v628_v45 = vshrl.u32 %v288_v62, 16  ;;  %v3264_v53 = vpack.c.bf16 %v238_v30, %v238_v30  ;;  %vm3503_vm6 = vmand %vm1163_vm4, %vm920_vm0 }
  0x33   : > { %v410_v21 = vrot.slane %v3251_v41, 4 }
  0x34   : > { %v3171_v11 = vrot.slane %v628_v45, 7  ;;  %v1049_v5 = vrot.slane %v628_v45, 4 }
  0x36   : > { %799 = vrot.lane.b32.xlu2 %v3096_v60, %s2990_s23  ;;  %v3177_v25 = vor.u32 %v631_v12, %v3171_v11  ;;  %v644_v60 = vshrl.u32 %v3174_v18, 16 }
  0x38   : > { %v3187_v34 = vrot.slane %v644_v60, 7  ;;  %v1058_v30 = vrot.slane %v644_v60, 4 }
  0x3a   : > { %1077 = vrot.lane.b32.xlu1 %v949_v1, %s2991_s24  ;;  %843 = vrot.lane.b32.xlu0 %v3085_v46, %s2990_s23  ;;  %v946_v46 = vsel %vm3079_vm2, %v944_v14, %v945_v35  ;;  %v3196_v42 = vor.u32 %v647_v36, %v3187_v34  ;;  %v3202_v35 = vrot.slane %v468_v44, 7  ;;  %v1056_v1 = vor.u32 %v1055_v49, %v1053_v55 }
  0x3b   : > { %v1051_v14 = vor.u32 %v1050_v7, %v1049_v5  ;;  %v959_v5 = vrot.slane %v468_v44, 4  ;;  %v3257_v7 = vrot.slane %v580_v4, 7 }
  0x3c   : > { %v3208_v59 = vor.u32 %v471_v48, %v3202_v35 }
  0x3d   : > { %v1052_v45 = vrot.slane %v1051_v14, 4 }
  0x3e   : > { %1121 = vrot.lane.b32.xlu2 %v1048_v16, %s2991_s24 }
  0x3f   : > { %v1054_v49 = vsel %vm3079_vm2, %v1052_v45, %v1053_v55  ;;  %v960_v55 = vrot.slane %v471_v48, 5  ;;  %v426_v48 = vrot.slane %v3056_v19, 4 }
  0x41   : > { %v961_v45 = vor.u32 %v960_v55, %v959_v5  ;;  %v434_v55 = vsel %vm3303_vm11, %v426_v48, %v3088_v52  ;;  %v389_v48 = vld [vmem:[#allocation2 + $0x6c] sm:$0x8] }
  0x42   : > { %1119 = vrot.lane.b32.xlu1 %v1045_v27, %s2991_s24  ;;  %1075 = vrot.lane.b32.xlu0 %v946_v46, %s2991_s24 }
  0x43   : > { %v962_v5 = vrot.slane %v961_v45, 4 }
  0x46   : > { %805 = vrot.lane.b32.xlu2 %v3149_v33, %s2990_s23  ;;  %v1057_v33 = vrot.slane %v1056_v1, 4  ;;  %v476_v1 = vshrl.u32 %v269_v31, 16 }
  0x48   : > { %v478_v50 = vrot.slane %v476_v1, 7  ;;  %v965_v44 = vrot.slane %v476_v1, 4  ;;  %v356_v1 = vld [vmem:[#allocation2 + $0x14] sm:$0x8] }
  0x4a   : > { %803 = vrot.lane.b32.xlu1 %v3116_v9, %s2990_s23  ;;  %849 = vrot.lane.b32.xlu0 %v3134_v24, %s2990_s23  ;;  %v239_v24 = vld [vmem:[%s3044_s22 + $0x58] sm:$0xff]  ;;  %v953_v9 = vrot.slane %v952_v13, 4  ;;  %v1064_v13 = vrot.slane %v652_v0, 4 }
  0x4b   : > { %v3225_v16 = vpack.c.bf16 %v239_v24, %v239_v24 }
  0x4c   : > { %v955_v46 = vsel %vm3079_vm2, %v953_v9, %v954_v57  ;;  %v479_v57 = vshll.u32 %v269_v31, 16  ;;  %v602_v9 = vrot.slane %v3058_v22, 4  ;;  %v487_v22 = vshll.u32 %v3264_v53, 16 }
  0x4d   : > { %v492_v15 = vshrl.u32 %v3225_v16, 16  ;;  %v495_v27 = vshll.u32 %v3225_v16, 16 }
  0x4e   : > { %847 = vrot.lane.b32.xlu2 %v288_v62, %s2990_s23  ;;  %v3262_v14 = vor.u32 %v479_v57, %v478_v50 }
  0x4f   : > { %v494_v12 = vrot.slane %v492_v15, 7 }
  0x51   : > { %v3239_v62 = vor.u32 %v495_v27, %v494_v12  ;;  %v484_v12 = vshrl.u32 %v3264_v53, 16 }
  0x52   : > { %1125 = vrot.lane.b32.xlu1 %v1057_v33, %s2991_s24  ;;  %1081 = vrot.lane.b32.xlu0 %v958_v6, %s2991_s24  ;;  %v583_v33 = vshll.u32 %v3244_v58, 16  ;;  %v3260_v6 = vrot.slane %v655_v32, 5  ;;  %v963_v32 = vrot.slane %v479_v57, 5  ;;  %v1059_v57 = vrot.slane %v647_v36, 5  ;;  %v353_v36 = vld [vmem:[#allocation2 + $0xc] sm:$0x8] }
  0x53   : > { %v354_v52 = vsel %vm3286_vm8, 0, %v353_v36 }
  0x54   : > { %v3269_v24 = vor.u32 %v583_v33, %v3257_v7  ;;  %v1065_v0 = vor.u32 %v1064_v13, %v3260_v6  ;;  %v966_v19 = vor.u32 %v965_v44, %v963_v32  ;;  %v418_v13 = vsel %vm3303_vm11, %v410_v21, %v3074_v37  ;;  %355 = vst [vmem:[#allocation2 + $0xc] sm:$0x8] %v354_v52  ;;  %v305_v21 = vld [vmem:[#allocation2 + $0x10] sm:$0x1] }
  0x55   : > { %v1060_v45 = vor.u32 %v1059_v57, %v1058_v30  ;;  %v390_v37 = vsel %vm3286_vm8, 0, %v389_v48  ;;  %698 = vst.msk [vmem:[#allocation2 + $0xc] sm:$0xf] %vm691_vm10, %v418_v13  ;;  %v2992_v48 = vmov 0  }
  0x56   : > { %1079 = vrot.lane.b32.xlu2 %v955_v46, %s2991_s24  ;;  %v338_v46 = vld [vmem:[#allocation2 + $0x68] sm:$0x1]  ;;  %v967_v60 = vrot.slane %v966_v19, 4  ;;  %v1066_v44 = vrot.slane %v1065_v0, 4  ;;  %v964_v19 = vsel %vm3079_vm2, %v962_v5, %v963_v32  ;;  %v251_v0 = vld [vmem:[%s3044_s22 + $0xb8] sm:$0xff] }
  0x57   : > { %v339_v47 = vsel %vm3277_vm5, 0, %v338_v46  ;;  %v610_v46 = vsel %vm3303_vm11, %v602_v9, %v3060_v23  ;;  %391 = vst [vmem:[#allocation2 + $0x6c] sm:$0x8] %v390_v37  ;;  %v306_v9 = vsel %vm3277_vm5, 0, %v305_v21  ;;  %v1061_v30 = vrot.slane %v1060_v45, 4 }
  0x58   : > { %340 = vst [vmem:[#allocation2 + $0x68] sm:$0x1] %v339_v47  ;;  %v241_v47 = vld [vmem:[%s3044_s22 + $0x68] sm:$0xff]  ;;  %v283_v5 = vpack.c.bf16 %v251_v0, %v251_v0  ;;  %v969_v37 = vrot.slane %v487_v22, 5 }
  0x59   : > { %v3341_v32 = vpack.c.bf16 %v241_v47, %v241_v47  ;;  %746 = vst.msk [vmem:[#allocation2 + $0x6c] sm:$0xf] %vm691_vm10, %v610_v46  ;;  %v968_v47 = vrot.slane %v484_v12, 4  ;;  %v302_v0 = vld [vmem:[#allocation2 + $0x8] sm:$0x1] }
  0x5a   : > { %809 = vrot.lane.b32.xlu1 %v269_v31, %s2990_s23  ;;  %1123 = vrot.lane.b32.xlu0 %v1054_v49, %s2991_s24  ;;  %307 = vst [vmem:[#allocation2 + $0x10] sm:$0x1] %v306_v9  ;;  %v591_v13 = vshll.u32 %v283_v5, 16  ;;  %v303_v9 = vsel %vm3277_vm5, 0, %v302_v0  ;;  %v409_v0 = vor.u32 %v407_v54, %v3251_v41  ;;  %v3851_v31 = vld [vmem:[%s4203_s1] ss:$0 sm:$0xff] }
  0x5b   : > { %v508_v36 = vshrl.u32 %v3341_v32, 16  ;;  %v511_v45 = vshll.u32 %v3341_v32, 16  ;;  %293 = vst.msk [vmem:[#allocation2] sm:$0xf] %vm292_vm15, %v2992_v48 }
  0x5c   : > { %294 = vst.msk [vmem:[#allocation2 + $0x4] sm:$0xf] %vm292_vm15, %v2992_v48 }
  0x5d   : > { %296 = vst.msk [vmem:[#allocation2 + $0x88] sm:$0xf] %vm292_vm15, %v2992_v48 }
  0x5e   : > { %853 = vrot.lane.b32.xlu2 %v3205_v51, %s2990_s23  ;;  %v3296_v51 = vrot.slane %v484_v12, 7  ;;  %297 = vst.msk [vmem:[#allocation2 + $0x8c] sm:$0xf] %vm292_vm15, %v2992_v48  ;;  %v2861_v48 = vld [vmem:[%s4205_s3 + $0x10] sm:$0xf] }
  0x5f   : > { %v743_v23 = vld [vmem:[#allocation2 + $0x68] sm:$0xf]  ;;  %304 = vst [vmem:[#allocation2 + $0x8] sm:$0x1] %v303_v9 }
  0x60   : > { %v744_v57 = vsel %vm3330_vm13, %v3066_v28, %v743_v23  ;;  %v1063_v28 = vsel %vm3079_vm2, %v1061_v30, %v3260_v6  ;;  %v1023_v6 = vrot.slane %v583_v33, 5 }
  0x61   : > { %745 = vst [vmem:[#allocation2 + $0x68] sm:$0xf] %v744_v57  ;;  %v699_v30 = vld [vmem:[#allocation2 + $0x10] sm:$0xf] }
  0x62   : > { %851 = vrot.lane.b32.xlu1 %v3174_v18, %s2990_s23  ;;  %807 = vrot.lane.b32.xlu0 %v3190_v39, %s2990_s23  ;;  %v357_v39 = vsel %vm3286_vm8, 0, %v356_v1  ;;  %v3315_v18 = vor.u32 %v487_v22, %v3296_v51  ;;  %v588_v22 = vshrl.u32 %v283_v5, 16 }
  0x63   : > { %358 = vst [vmem:[#allocation2 + $0x14] sm:$0x8] %v357_v39  ;;  %v3351_v39 = vrot.slane %v495_v27, 5  ;;  %v1022_v27 = vrot.slane %v580_v4, 4  ;;  %v2743_v4 = vld [vmem:[%s4205_s3] sm:$0xf] }
  0x64   : > { %702 = vst.msk [vmem:[#allocation2 + $0x14] sm:$0xf] %vm691_vm10, %v434_v55  ;;  %v974_v55 = vrot.slane %v492_v15, 4  ;;  %v510_v15 = vrot.slane %v508_v36, 7  ;;  %v2883_v9 = vld [vmem:[#allocation2] sm:$0xff] }
  0x66   : > { %1085 = vrot.lane.b32.xlu2 %v967_v60, %s2991_s24  ;;  %v975_v46 = vor.u32 %v974_v55, %v3351_v39  ;;  %v3385_v21 = vor.u32 %v511_v45, %v510_v15  ;;  %v590_v15 = vrot.slane %v588_v22, 7 }
  0x6a   : > { %1083 = vrot.lane.b32.xlu1 %v964_v19, %s2991_s24  ;;  %1129 = vrot.lane.b32.xlu0 %v1066_v44, %s2991_s24  ;;  %v240_v44 = vld [vmem:[%s3044_s22 + $0x60] sm:$0xff] }
  0x6b   : > { %v3366_v52 = vpack.c.bf16 %v240_v44, %v240_v44  ;;  %v2899_v19 = vld [vmem:[%s4205_s3] sm:$0x30]  ;;  %v1024_v44 = vor.u32 %v1023_v6, %v1022_v27  ;;  %v2659_v6 = vld [vmem:[%s4205_s3 + $0x8] sm:$0xf] }
  0x6c   : > { %v2744_v12 = vor.u32 %v2899_v19, %v2743_v4  ;;  %v1026_v4 = vrot.slane %v591_v13, 5  ;;  %v970_v19 = vor.u32 %v969_v37, %v968_v47  ;;  %v2916_v47 = vld [vmem:[%s4205_s3 + $0x8] sm:$0x30] }
  0x6d   : > { %v840_v60 = vpop.permute.xlu2 %839  ;;  %v500_v33 = vshrl.u32 %v3366_v52, 16  ;;  %v503_v23 = vshll.u32 %v3366_v52, 16  ;;  %v1025_v54 = vrot.slane %v1024_v44, 4 }
  0x6e   : > { %912 = vst.msk [vmem:[#allocation2 + $0x68] sm:$0xf] %vm887_vm14, %v840_v60  ;;  %1127 = vrot.lane.b32.xlu2 %v1063_v28, %s2991_s24  ;;  %v1668_v55 = vsel %vm1441_vm1, %v2744_v12, 0  ;;  %v1028_v60 = vrot.slane %v588_v22, 4  ;;  %v976_v28 = vrot.slane %v975_v46, 4  ;;  %v242_v12 = vld [vmem:[%s3044_s22 + $0x70] sm:$0xff]  ;;  %v3420_v46 = vor.u32 %v591_v13, %v590_v15 }
  0x6f   : > { %v3398_v57 = vrot.slane %v500_v33, 7  ;;  %1677 = vmatpush.bf16.msra.mxu1 %v1668_v55  ;;  %v2660_v22 = vor.u32 %v2916_v47, %v2659_v6  ;;  %v3430_v38 = vpack.c.bf16 %v242_v12, %v242_v12  ;;  %v618_v13 = vrot.slane %v3099_v63, 4  ;;  %v341_v6 = vld [vmem:[#allocation2 + $0x70] sm:$0x1] }
  0x70   : > { %v1029_v37 = vor.u32 %v1028_v60, %v1026_v4  ;;  %v1027_v63 = vsel %vm3079_vm2, %v1025_v54, %v1026_v4  ;;  %v3451_v15 = vrot.slane %v511_v45, 5  ;;  %v442_v4 = vrot.slane %v3118_v10, 4 }
  0x71   : > { %v1443_v60 = vsel %vm1441_vm1, %v2660_v22, 0  ;;  %v516_v44 = vshrl.u32 %v3430_v38, 16  ;;  %v519_v12 = vshll.u32 %v3430_v38, 16 }
  0x72   : > { %837 = vrot.lane.b32.xlu1 %v283_v5, %s2990_s23  ;;  %813 = vrot.lane.b32.xlu0 %v3225_v16, %s2990_s23  ;;  %v700_v16 = vsel %vm3330_vm13, %v3063_v26, %v699_v30  ;;  %v3408_v5 = vor.u32 %v503_v23, %v3398_v57  ;;  %v2933_v26 = vld [vmem:[%s4205_s3 + $0x10] sm:$0x30]  ;;  %v971_v30 = vrot.slane %v970_v19, 4  ;;  %v450_v54 = vsel %vm3303_vm11, %v442_v4, %v3105_v2  ;;  %v243_v2 = vld [vmem:[%s3044_s22 + $0x78] sm:$0xff] }
  0x73   : > { %701 = vst [vmem:[#allocation2 + $0x10] sm:$0xf] %v700_v16  ;;  %v2862_v27 = vor.u32 %v2933_v26, %v2861_v48  ;;  %2745 = vmatmul.msk.bf16.vlgmr.msra.gmra.mxu1 %vm1392_vm3, %v2883_v9  ;;  %2934 = vmatpush.bf16.msra.mxu3 %v1443_v60  ;;  %v983_v48 = vrot.slane %v508_v36, 4  ;;  %v3458_v26 = vrot.slane %v516_v44, 7 }
  0x74   : > { %1452 = vmatpush.bf16.msra.mxu0 %v1443_v60  ;;  %v973_v19 = vsel %vm3079_vm2, %v971_v30, %v3351_v39  ;;  %v308_v39 = vld [vmem:[#allocation2 + $0x18] sm:$0x1]  ;;  %v978_v30 = vrot.slane %v503_v23, 5 }
  0x75   : > { %v3436_v41 = vsel %vm1441_vm1, %v2862_v27, 0  ;;  %v3469_v36 = vor.u32 %v519_v12, %v3458_v26  ;;  %v984_v9 = vor.u32 %v983_v48, %v3451_v15  ;;  %v309_v10 = vsel %vm3277_vm5, 0, %v308_v39 }
  0x76   : > { %811 = vrot.lane.b32.xlu2 %v3264_v53, %s2990_s23  ;;  %1941 = vmatpush.bf16.msra.mxu2 %v3436_v41  ;;  %v694_v53 = vld [vmem:[#allocation2 + $0x8] sm:$0xf]  ;;  %310 = vst [vmem:[#allocation2 + $0x18] sm:$0x1] %v309_v10  ;;  %v275_v10 = vpack.c.bf16 %v243_v2, %v243_v2 }
  0x77   : > { %2935 = vmatpush.bf16.msrb.mxu3 %v1668_v55  ;;  %v626_v55 = vsel %vm3303_vm11, %v618_v13, %v3164_v56  ;;  %v359_v56 = vld [vmem:[#allocation2 + $0x1c] sm:$0x8]  ;;  %v977_v13 = vrot.slane %v500_v33, 4 }
  0x78   : > { %v3439_v16 = vpop.permute.xlu2 %1073  ;;  %v360_v22 = vsel %vm3286_vm8, 0, %v359_v56 }
  0x79   : > { %v979_v60 = vor.u32 %v978_v30, %v977_v13  ;;  %361 = vst [vmem:[#allocation2 + $0x1c] sm:$0x8] %v360_v22 }
  0x7a   : > { %1089 = vrot.lane.b32.xlu1 %v976_v28, %s2991_s24  ;;  %835 = vrot.lane.b32.xlu0 %v3244_v58, %s2990_s23  ;;  %v695_v28 = vsel %vm3330_vm13, %v409_v0, %v694_v53  ;;  %v1030_v58 = vrot.slane %v1029_v37, 4  ;;  %v392_v0 = vld [vmem:[#allocation2 + $0x74] sm:$0x8]  ;;  %v985_v53 = vrot.slane %v984_v9, 4  ;;  %706 = vst.msk [vmem:[#allocation2 + $0x1c] sm:$0xf] %vm691_vm10, %v450_v54 }
  0x7b   : > { %696 = vst [vmem:[#allocation2 + $0x8] sm:$0xf] %v695_v28  ;;  %v393_v45 = vsel %vm3286_vm8, 0, %v392_v0  ;;  %v342_v28 = vsel %vm3277_vm5, 0, %v341_v6  ;;  %v987_v0 = vrot.slane %v519_v12, 5 }
  0x7c   : > { %394 = vst [vmem:[#allocation2 + $0x74] sm:$0x8] %v393_v45 }
  0x7d   : > { %750 = vst.msk [vmem:[#allocation2 + $0x74] sm:$0xf] %vm691_vm10, %v626_v55  ;;  %v703_v55 = vld [vmem:[#allocation2 + $0x18] sm:$0xf] }
  0x7e   : > { %1113 = vrot.lane.b32.xlu2 %v1030_v58, %s2991_s24  ;;  %v245_v58 = vld [vmem:[%s3044_s22 + $0x88] sm:$0xff]  ;;  %343 = vst [vmem:[#allocation2 + $0x70] sm:$0x1] %v342_v28  ;;  %v704_v45 = vsel %vm3330_vm13, %v3126_v17, %v703_v55 }
  0x7f   : > { %v3497_v33 = vpack.c.bf16 %v245_v58, %v245_v58  ;;  %705 = vst [vmem:[#allocation2 + $0x18] sm:$0xf] %v704_v45 }
  0x80   : > { %v1116_v27 = vpop.permute.xlu2 %1115 }
  0x81   : > { %1214 = vst.msk [vmem:[#allocation2 + $0x68] sm:$0xf] %vm1163_vm4, %v1116_v27  ;;  %v527_v27 = vshll.u32 %v275_v10, 16 }
  0x82   : > { %1111 = vrot.lane.b32.xlu1 %v1027_v63, %s2991_s24  ;;  %1087 = vrot.lane.b32.xlu0 %v973_v19, %s2991_s24  ;;  %v244_v63 = vld [vmem:[%s3044_s22 + $0x80] sm:$0xff]  ;;  %v986_v19 = vrot.slane %v516_v44, 4  ;;  %v540_v44 = vshrl.u32 %v3497_v33, 16 }
  0x83   : > { %v3499_v23 = vpack.c.bf16 %v244_v63, %v244_v63  ;;  %v990_v58 = vrot.slane %v527_v27, 5 }
  0x84   : > { %v798_v47 = vpop.permute.xlu0 %797  ;;  %v794_v37 = vpop.permute.xlu1 %793  ;;  %v988_v6 = vor.u32 %v987_v0, %v986_v19  ;;  %v1001_v45 = vrot.slane %v540_v44, 4 }
  0x85   : > { %891 = vst.msk [vmem:[#allocation2 + $0x14] sm:$0xf] %vm887_vm14, %v798_v47  ;;  %v532_v12 = vshrl.u32 %v3499_v23, 16  ;;  %v542_v47 = vrot.slane %v540_v44, 7  ;;  %v747_v54 = vld [vmem:[#allocation2 + $0x70] sm:$0xf] }
  0x86   : > { %889 = vst.msk [vmem:[#allocation2 + $0xc] sm:$0xf] %vm887_vm14, %v794_v37  ;;  %817 = vrot.lane.b32.xlu2 %v3341_v32, %s2990_s23  ;;  %v980_v32 = vrot.slane %v979_v60, 4  ;;  %v543_v37 = vshll.u32 %v3497_v33, 16  ;;  %v748_v13 = vsel %vm3330_vm13, %v3108_v3, %v747_v54  ;;  %v524_v60 = vshrl.u32 %v275_v10, 16 }
  0x87   : > { %v3526_v22 = vrot.slane %v532_v12, 7  ;;  %749 = vst [vmem:[#allocation2 + $0x70] sm:$0xf] %v748_v13  ;;  %v989_v28 = vrot.slane %v988_v6, 4  ;;  %v995_v2 = vrot.slane %v532_v12, 4 }
  0x88   : > { %v3510_v4 = vpop.permute.xlu2 %1067  ;;  %v982_v17 = vsel %vm3079_vm2, %v980_v32, %v3451_v15  ;;  %v3533_v30 = vor.u32 %v543_v37, %v542_v47  ;;  %v992_v32 = vrot.slane %v524_v60, 4  ;;  %v526_v47 = vrot.slane %v524_v60, 7  ;;  %v311_v44 = vld [vmem:[#allocation2 + $0x20] sm:$0x1] }
  0x8a   : > { %1093 = vrot.lane.b32.xlu1 %v985_v53, %s2991_s24  ;;  %815 = vrot.lane.b32.xlu0 %v3366_v52, %s2990_s23  ;;  %v458_v53 = vrot.slane %v3131_v20, 4  ;;  %v3563_v13 = vor.u32 %v527_v27, %v526_v47 }
  0x8c   : > { %v842_v39 = vpop.permute.xlu0 %841  ;;  %v1171_v9 = vld [vmem:[#allocation2 + $0x14] sm:$0xf]  ;;  %v796_v56 = vpop.permute.xlu1 %795 }
  0x8d   : > { %913 = vst.msk [vmem:[#allocation2 + $0x6c] sm:$0xf] %vm887_vm14, %v842_v39  ;;  %v1172_v52 = vsel %vm3503_vm6, %v3439_v16, %v1171_v9  ;;  %v535_v16 = vshll.u32 %v3499_v23, 16  ;;  %v362_v39 = vld [vmem:[#allocation2 + $0x24] sm:$0x8]  ;;  %v466_v9 = vsel %vm3303_vm11, %v458_v53, %v3162_v61  ;;  %v312_v61 = vsel %vm3277_vm5, 0, %v311_v44 }
  0x8e   : > { %1173 = vst [vmem:[#allocation2 + $0x14] sm:$0xf] %v1172_v52  ;;  %1091 = vrot.lane.b32.xlu2 %v982_v17, %s2991_s24  ;;  %v991_v52 = vsel %vm3079_vm2, %v989_v28, %v990_v58  ;;  %v363_v6 = vsel %vm3286_vm8, 0, %v362_v39  ;;  %v247_v17 = vld [vmem:[%s3044_s22 + $0x98] sm:$0xff] }
  0x8f   : > { %890 = vst.msk [vmem:[#allocation2 + $0x10] sm:$0xf] %vm887_vm14, %v796_v56  ;;  %v3536_v15 = vor.u32 %v535_v16, %v3526_v22  ;;  %v996_v19 = vrot.slane %v535_v16, 5  ;;  %v993_v56 = vor.u32 %v992_v32, %v990_v58  ;;  %v3555_v16 = vpack.c.bf16 %v247_v17, %v247_v17  ;;  %v395_v53 = vld [vmem:[#allocation2 + $0x7c] sm:$0x8] }
  0x90   : > { %v800_v63 = vpop.permute.xlu2 %799  ;;  %364 = vst [vmem:[#allocation2 + $0x24] sm:$0x8] %v363_v6 }
  0x91   : > { %892 = vst.msk [vmem:[#allocation2 + $0x18] sm:$0xf] %vm887_vm14, %v800_v63  ;;  %v997_v12 = vor.u32 %v996_v19, %v995_v2  ;;  %v556_v28 = vshrl.u32 %v3555_v16, 16  ;;  %v396_v2 = vsel %vm3286_vm8, 0, %v395_v53  ;;  %v1167_v19 = vld [vmem:[#allocation2 + $0xc] sm:$0xf] }
  0x92   : > { %821 = vrot.lane.b32.xlu0 %v275_v10, %s2990_s23  ;;  %819 = vrot.lane.b32.xlu1 %v3430_v38, %s2990_s23  ;;  %v999_v38 = vrot.slane %v543_v37, 5  ;;  %v634_v10 = vrot.slane %v3171_v11, 4  ;;  %v994_v37 = vrot.slane %v993_v56, 4  ;;  %710 = vst.msk [vmem:[#allocation2 + $0x24] sm:$0xf] %vm691_vm10, %v466_v9 }
  0x93   : > { %v344_v11 = vld [vmem:[#allocation2 + $0x78] sm:$0x1]  ;;  %313 = vst [vmem:[#allocation2 + $0x20] sm:$0x1] %v312_v61  ;;  %v998_v63 = vrot.slane %v997_v12, 4  ;;  %v1010_v9 = vrot.slane %v556_v28, 4 }
  0x94   : > { %v1215_v3 = vld [vmem:[#allocation2 + $0x6c] sm:$0xf]  ;;  %v1118_v0 = vpop.permute.xlu0 %1117  ;;  %v1072_v55 = vpop.permute.xlu1 %1071  ;;  %v1002_v54 = vor.u32 %v1001_v45, %v999_v38  ;;  %v345_v60 = vsel %vm3277_vm5, 0, %v344_v11  ;;  %397 = vst [vmem:[#allocation2 + $0x7c] sm:$0x8] %v396_v2  ;;  %v558_v56 = vrot.slane %v556_v28, 7 }
  0x95   : > { %v1216_v20 = vsel %vm3503_vm6, %v1118_v0, %v1215_v3  ;;  %1170 = vst.msk [vmem:[#allocation2 + $0x10] sm:$0xf] %vm1163_vm4, %v1072_v55  ;;  %v642_v55 = vsel %vm3303_vm11, %v634_v10, %v3153_v40  ;;  %v1000_v40 = vsel %vm3079_vm2, %v998_v63, %v999_v38  ;;  %v246_v10 = vld [vmem:[%s3044_s22 + $0x90] sm:$0xff]  ;;  %v248_v28 = vld [vmem:[%s3044_s22 + $0xa0] sm:$0xff] }
  0x96   : > { %1217 = vst [vmem:[#allocation2 + $0x6c] sm:$0xf] %v1216_v20  ;;  %1097 = vrot.lane.b32.xlu2 %v994_v37, %s2991_s24  ;;  %v1003_v45 = vrot.slane %v1002_v54, 4  ;;  %v280_v2 = vpack.c.bf16 %v248_v28, %v248_v28 }
  0x97   : > { %346 = vst [vmem:[#allocation2 + $0x78] sm:$0x1] %v345_v60 }
  0x98   : > { %v3568_v58 = vpop.permute.xlu2 %1121  ;;  %754 = vst.msk [vmem:[#allocation2 + $0x7c] sm:$0xf] %vm691_vm10, %v642_v55 }
  0x9a   : > { %1095 = vrot.lane.b32.xlu0 %v991_v52, %s2991_s24  ;;  %825 = vrot.lane.b32.xlu1 %v3497_v33, %s2990_s23  ;;  %v559_v33 = vshll.u32 %v3555_v16, 16  ;;  %v3590_v52 = vpack.c.bf16 %v246_v10, %v246_v10  ;;  %v707_v12 = vld [vmem:[#allocation2 + $0x20] sm:$0xf]  ;;  %v314_v10 = vld [vmem:[#allocation2 + $0x28] sm:$0x1] }
  0x9c   : > { %v1070_v27 = vpop.permute.xlu1 %1069  ;;  %v792_v3 = vpop.permute.xlu0 %791  ;;  %v2917_v0 = vld [vmem:[#allocation2 + $0x10] sm:$0xff]  ;;  %v3581_v39 = vrot.slane %v559_v33, 5  ;;  %v3593_v6 = vor.u32 %v559_v33, %v558_v56  ;;  %v548_v47 = vshrl.u32 %v3590_v52, 16  ;;  %v551_v54 = vshll.u32 %v3590_v52, 16  ;;  %v249_v33 = vld [vmem:[%s3044_s22 + $0xa8] sm:$0xff] }
  0x9d   : > { %v1168_v32 = vsel %vm3503_vm6, %v1070_v27, %v1167_v19  ;;  %888 = vst.msk [vmem:[#allocation2 + $0x8] sm:$0xf] %vm887_vm14, %v792_v3  ;;  %v2912_v20 = vld [vmem:[#allocation2 + $0x68] sm:$0xff]  ;;  %2863 = vmatmul.msk.bf16.vlgmr.msra.gmra.mxu2 %vm1392_vm3, %v2917_v0  ;;  %v650_v19 = vrot.slane %v3187_v34, 4  ;;  %v564_v3 = vshrl.u32 %v280_v2, 16  ;;  %v567_v0 = vshll.u32 %v280_v2, 16 }
  0x9e   : > { %1169 = vst [vmem:[#allocation2 + $0xc] sm:$0xf] %v1168_v32  ;;  %2673 = vmatmul.msk.bf16.vlgmr.msra.gmra.mxu3 %vm1392_vm3, %v2912_v20  ;;  %v751_v38 = vld [vmem:[#allocation2 + $0x78] sm:$0xf]  ;;  %v1011_v17 = vor.u32 %v1010_v9, %v3581_v39  ;;  %823 = vrot.lane.b32.xlu2 %v3499_v23, %s2990_s23  ;;  %v3611_v11 = vrot.slane %v548_v47, 7  ;;  %v3636_v34 = vpack.c.bf16 %v249_v33, %v249_v33  ;;  %v2901_v33 = vld [vmem:[#allocation2 + $0x10] sm:$0xff] }
  0x9f   : > { %1164 = vst.msk [vmem:[#allocation2 + $0x8] sm:$0xf] %vm1163_vm4, %v3510_v4  ;;  %2936 = vmatpush.bf16.msra.mxu3 %v3436_v41  ;;  %v708_v4 = vsel %vm3330_vm13, %v3145_v29, %v707_v12  ;;  %v474_v41 = vrot.slane %v3202_v35, 4  ;;  %v752_v29 = vsel %vm3330_vm13, %v3177_v25, %v751_v38  ;;  %v365_v25 = vld [vmem:[#allocation2 + $0x2c] sm:$0x8]  ;;  %v1014_v9 = vrot.slane %v567_v0, 5 }
  0xa0   : > { %v806_v37 = vpop.permute.xlu2 %805  ;;  %709 = vst [vmem:[#allocation2 + $0x20] sm:$0xf] %v708_v4  ;;  %v1012_v53 = vrot.slane %v1011_v17, 4  ;;  %v3617_v60 = vor.u32 %v551_v54, %v3611_v11  ;;  %v366_v27 = vsel %vm3286_vm8, 0, %v365_v25  ;;  %v398_v12 = vld [vmem:[#allocation2 + $0x84] sm:$0x8]  ;;  %v658_v4 = vsel %vm3303_vm11, %v650_v19, %v3222_v8 }
  0xa1   : > { %895 = vst.msk [vmem:[#allocation2 + $0x24] sm:$0xf] %vm887_vm14, %v806_v37  ;;  %v482_v63 = vsel %vm3303_vm11, %v474_v41, %v3262_v14  ;;  %v575_v38 = vshll.u32 %v3636_v34, 16  ;;  %v399_v17 = vsel %vm3286_vm8, 0, %v398_v12  ;;  %v3650_v37 = vrot.slane %v564_v3, 7 }
  0xa2   : > { %1101 = vrot.lane.b32.xlu0 %v1003_v45, %s2991_s24  ;;  %1099 = vrot.lane.b32.xlu1 %v1000_v40, %s2991_s24  ;;  %753 = vst [vmem:[#allocation2 + $0x78] sm:$0xf] %v752_v29  ;;  %v1013_v45 = vrot.slane %v564_v3, 4  ;;  %v1004_v25 = vrot.slane %v548_v47, 4 }
  0xa3   : > { %367 = vst [vmem:[#allocation2 + $0x2c] sm:$0x8] %v366_v27  ;;  %v3658_v8 = vor.u32 %v567_v0, %v3650_v37 }
  0xa4   : > { %v846_v44 = vpop.permute.xlu1 %845  ;;  %v802_v61 = vpop.permute.xlu0 %801  ;;  %714 = vst.msk [vmem:[#allocation2 + $0x2c] sm:$0xf] %vm691_vm10, %v482_v63  ;;  %v1015_v41 = vor.u32 %v1014_v9, %v1013_v45  ;;  %v1005_v63 = vrot.slane %v551_v54, 5  ;;  %v387_v9 = vsel %vm3286_vm8, 0, %v386_v43 }
  0xa5   : > { %915 = vst.msk [vmem:[#allocation2 + $0x74] sm:$0xf] %vm887_vm14, %v846_v44 }
  0xa6   : > { %893 = vst.msk [vmem:[#allocation2 + $0x1c] sm:$0xf] %vm887_vm14, %v802_v61  ;;  %v2900_v35 = vld [vmem:[#allocation2 + $0x8] sm:$0xff]  ;;  %829 = vrot.lane.b32.xlu2 %v3555_v16, %s2990_s23  ;;  %v315_v61 = vsel %vm3277_vm5, 0, %v314_v10  ;;  %v1006_v27 = vor.u32 %v1005_v63, %v1004_v25  ;;  %v368_v10 = vld [vmem:[#allocation2 + $0x34] sm:$0x8] }
  0xa7   : > { %v2884_v23 = vld [vmem:[#allocation2 + $0x8] sm:$0xff]  ;;  %2661 = vmatmul.msk.bf16.vlgmr.msra.gmra.mxu0 %vm1392_vm3, %v2900_v35  ;;  %400 = vst [vmem:[#allocation2 + $0x84] sm:$0x8] %v399_v17  ;;  %v1016_v35 = vrot.slane %v1015_v41, 4 }
  0xa8   : > { %2746 = vmatmul.msk.bf16.gmra.mxu1 %vm1392_vm3, %v2884_v23  ;;  %v848_v55 = vpop.permute.xlu2 %847  ;;  %758 = vst.msk [vmem:[#allocation2 + $0x84] sm:$0xf] %vm691_vm10, %v658_v4  ;;  %v3665_v23 = vrot.slane %v575_v38, 5  ;;  %v1007_v3 = vrot.slane %v1006_v27, 4  ;;  %v369_v4 = vsel %vm3286_vm8, 0, %v368_v10 }
  0xa9   : > { %916 = vst.msk [vmem:[#allocation2 + $0x78] sm:$0xf] %vm887_vm14, %v848_v55 }
  0xaa   : > { %1105 = vrot.lane.b32.xlu1 %v1012_v53, %s2991_s24  ;;  %827 = vrot.lane.b32.xlu0 %v3590_v52, %s2990_s23  ;;  %316 = vst [vmem:[#allocation2 + $0x28] sm:$0x1] %v315_v61  ;;  %v1018_v19 = vsel %vm3079_vm2, %v1016_v35, %v3665_v23  ;;  %v586_v52 = vrot.slane %v3257_v7, 4  ;;  %v1009_v55 = vsel %vm3079_vm2, %v1007_v3, %v3581_v39 }
  0xab   : > { %388 = vst [vmem:[#allocation2 + $0x64] sm:$0x8] %v387_v9 }
  0xac   : > { %v1078_v14 = vpop.permute.xlu1 %1077  ;;  %v844_v32 = vpop.permute.xlu0 %843  ;;  %v1219_v20 = vld [vmem:[#allocation2 + $0x74] sm:$0xf]  ;;  %v594_v39 = vsel %vm3303_vm11, %v586_v52, %v3420_v46  ;;  %370 = vst [vmem:[#allocation2 + $0x34] sm:$0x8] %v369_v4 }
  0xad   : > { %v1175_v40 = vld [vmem:[#allocation2 + $0x1c] sm:$0xf]  ;;  %914 = vst.msk [vmem:[#allocation2 + $0x70] sm:$0xf] %vm887_vm14, %v844_v32  ;;  %v1220_v56 = vsel %vm3503_vm6, %v3568_v58, %v1219_v20  ;;  %v347_v58 = vld [vmem:[#allocation2 + $0x80] sm:$0x1] }
  0xae   : > { %v1176_v16 = vsel %vm3503_vm6, %v1078_v14, %v1175_v40  ;;  %1221 = vst [vmem:[#allocation2 + $0x74] sm:$0xf] %v1220_v56  ;;  %v348_v44 = vsel %vm3277_vm5, 0, %v347_v58  ;;  %1103 = vrot.lane.b32.xlu2 %v1009_v55, %s2991_s24  ;;  %v490_v40 = vrot.slane %v3296_v51, 4  ;;  %v317_v56 = vld [vmem:[#allocation2 + $0x30] sm:$0x1] }
  0xaf   : > { %1177 = vst [vmem:[#allocation2 + $0x1c] sm:$0xf] %v1176_v16  ;;  %v572_v16 = vshrl.u32 %v3636_v34, 16  ;;  %v318_v46 = vsel %vm3277_vm5, 0, %v317_v56 }
  0xb0   : > { %349 = vst [vmem:[#allocation2 + $0x80] sm:$0x1] %v348_v44  ;;  %v1080_v29 = vpop.permute.xlu2 %1079  ;;  %v498_v51 = vsel %vm3303_vm11, %v490_v40, %v3239_v62  ;;  %v335_v44 = vld [vmem:[#allocation2 + $0x60] sm:$0x1]  ;;  %v522_v40 = vrot.slane %v3458_v26, 4 }
  0xb1   : > { %v711_v54 = vld [vmem:[#allocation2 + $0x28] sm:$0xf]  ;;  %742 = vst.msk [vmem:[#allocation2 + $0x64] sm:$0xf] %vm691_vm10, %v594_v39  ;;  %v1019_v58 = vrot.slane %v572_v16, 4  ;;  %v336_v35 = vsel %vm3277_vm5, 0, %v335_v44 }
  0xb2   : > { %833 = vrot.lane.b32.xlu0 %v3636_v34, %s2990_s23  ;;  %831 = vrot.lane.b32.xlu1 %v280_v2, %s2990_s23  ;;  %v2885_v2 = vld [vmem:[#allocation2 + $0x10] sm:$0xff]  ;;  %319 = vst [vmem:[#allocation2 + $0x30] sm:$0x1] %v318_v46  ;;  %v574_v62 = vrot.slane %v572_v16, 7  ;;  %v320_v39 = vld [vmem:[#allocation2 + $0x38] sm:$0x1]  ;;  %v530_v46 = vsel %vm3303_vm11, %v522_v40, %v3563_v13 }
  0xb3   : > { %718 = vst.msk [vmem:[#allocation2 + $0x34] sm:$0xf] %vm691_vm10, %v498_v51  ;;  %v1020_v63 = vor.u32 %v1019_v58, %v3665_v23  ;;  %v374_v16 = vld [vmem:[#allocation2 + $0x44] sm:$0x8] }
  0xb4   : > { %v1120_v53 = vpop.permute.xlu1 %1119  ;;  %v1076_v28 = vpop.permute.xlu0 %1075  ;;  %337 = vst [vmem:[#allocation2 + $0x60] sm:$0x1] %v336_v35 }
  0xb5   : > { %1218 = vst.msk [vmem:[#allocation2 + $0x70] sm:$0xf] %vm1163_vm4, %v1120_v53 }
  0xb6   : > { %1174 = vst.msk [vmem:[#allocation2 + $0x18] sm:$0xf] %vm1163_vm4, %v1076_v28 }
  0xb7   : > { %2662 = vmatmul.msk.bf16.gmra.mxu0 %vm1392_vm3, %v2901_v33  ;;  %v755_v0 = vld [vmem:[#allocation2 + $0x80] sm:$0xf]  ;;  %v1021_v33 = vrot.slane %v1020_v63, 4 }
  0xb8   : > { %2747 = vmatmul.msk.bf16.gmra.mxu1 %vm1392_vm3, %v2885_v2  ;;  %v756_v47 = vsel %vm3330_vm13, %v3196_v42, %v755_v0  ;;  %v854_v14 = vpop.permute.xlu2 %853  ;;  %v712_v42 = vsel %vm3330_vm13, %v3208_v59, %v711_v54  ;;  %v1179_v59 = vld [vmem:[#allocation2 + $0x24] sm:$0xf]  ;;  %v3721_v2 = vor.u32 %v575_v38, %v574_v62 }
  0xb9   : > { %757 = vst [vmem:[#allocation2 + $0x80] sm:$0xf] %v756_v47  ;;  %1109 = vrot.lane.b32.xlu2 %v1021_v33, %s2991_s24  ;;  %v715_v27 = vld [vmem:[#allocation2 + $0x30] sm:$0xf]  ;;  %v506_v47 = vrot.slane %v3398_v57, 4 }
  0xba   : > { %1107 = vrot.lane.b32.xlu0 %v1018_v19, %s2991_s24  ;;  %919 = vst.msk [vmem:[#allocation2 + $0x84] sm:$0xf] %vm887_vm14, %v854_v14  ;;  %v716_v23 = vsel %vm3330_vm13, %v3315_v18, %v715_v27  ;;  %v377_v27 = vld [vmem:[#allocation2 + $0x4c] sm:$0x8]  ;;  %s3921_s24 = scalar_lea.vmem %s4206_s4, %s2881_s19 }
  0xbb   : > { %713 = vst [vmem:[#allocation2 + $0x28] sm:$0xf] %v712_v42  ;;  %v739_v34 = vld [vmem:[#allocation2 + $0x60] sm:$0xf]  ;;  %v514_v57 = vsel %vm3303_vm11, %v506_v47, %v3385_v21  ;;  %v321_v21 = vsel %vm3277_vm5, 0, %v320_v39  ;;  %v554_v39 = vrot.slane %v3611_v11, 4 }
  0xbc   : > { %v804_v32 = vpop.permute.xlu1 %803  ;;  %v850_v20 = vpop.permute.xlu0 %849  ;;  %v2913_v45 = vld [vmem:[#allocation2 + $0x70] sm:$0xff]  ;;  %717 = vst [vmem:[#allocation2 + $0x30] sm:$0xf] %v716_v23  ;;  %v740_v38 = vsel %vm3330_vm13, %v3269_v24, %v739_v34  ;;  %v371_v24 = vld [vmem:[#allocation2 + $0x3c] sm:$0x8] }
  0xbd   : > { %894 = vst.msk [vmem:[#allocation2 + $0x20] sm:$0xf] %vm887_vm14, %v804_v32  ;;  %v2918_v7 = vld [vmem:[#allocation2 + $0x18] sm:$0xff]  ;;  %2674 = vmatmul.msk.bf16.gmra.mxu3 %vm1392_vm3, %v2913_v45  ;;  %v372_v42 = vsel %vm3286_vm8, 0, %v371_v24  ;;  %v562_v40 = vsel %vm3303_vm11, %v554_v39, %v3593_v6 }
  0xbe   : > { %917 = vst.msk [vmem:[#allocation2 + $0x7c] sm:$0xf] %vm887_vm14, %v850_v20  ;;  %2864 = vmatmul.msk.bf16.gmra.mxu2 %vm1392_vm3, %v2918_v7  ;;  %v2902_v28 = vld [vmem:[#allocation2 + $0x18] sm:$0xff] }
  0xbf   : > { %1178 = vst.msk [vmem:[#allocation2 + $0x20] sm:$0xf] %vm1163_vm4, %v1080_v29  ;;  %v2886_v25 = vld [vmem:[#allocation2 + $0x18] sm:$0xff] }
  0xc0   : > { %v1086_v12 = vpop.permute.xlu2 %1085  ;;  %741 = vst [vmem:[#allocation2 + $0x60] sm:$0xf] %v740_v38  ;;  %v326_v38 = vld [vmem:[#allocation2 + $0x48] sm:$0x1] }
  0xc1   : > { %373 = vst [vmem:[#allocation2 + $0x3c] sm:$0x8] %v372_v42  ;;  %v1227_v43 = vld [vmem:[#allocation2 + $0x84] sm:$0xf] }
  0xc2   : > { %722 = vst.msk [vmem:[#allocation2 + $0x3c] sm:$0xf] %vm691_vm10, %v514_v57 }
  0xc3   : > { %322 = vst [vmem:[#allocation2 + $0x38] sm:$0x1] %v321_v21  ;;  %v380_v21 = vld [vmem:[#allocation2 + $0x54] sm:$0x8] }
  0xc4   : > { %v1126_v17 = vpop.permute.xlu1 %1125  ;;  %v1082_v41 = vpop.permute.xlu0 %1081 }
  0xc5   : > { %v1223_v61 = vld [vmem:[#allocation2 + $0x7c] sm:$0xf]  ;;  %v1180_v29 = vsel %vm3503_vm6, %v1082_v41, %v1179_v59 }
  0xc6   : > { %v1224_v53 = vsel %vm3503_vm6, %v1126_v17, %v1223_v61  ;;  %1181 = vst [vmem:[#allocation2 + $0x24] sm:$0xf] %v1180_v29  ;;  %v323_v29 = vld [vmem:[#allocation2 + $0x40] sm:$0x1] }
  0xc7   : > { %1225 = vst [vmem:[#allocation2 + $0x7c] sm:$0xf] %v1224_v53  ;;  %2663 = vmatmul.msk.bf16.gmra.mxu0 %vm1392_vm3, %v2902_v28  ;;  %v324_v35 = vsel %vm3277_vm5, 0, %v323_v29  ;;  %v383_v29 = vld [vmem:[#allocation2 + $0x5c] sm:$0x8] }
  0xc8   : > { %2748 = vmatmul.msk.bf16.gmra.mxu1 %vm1392_vm3, %v2886_v25  ;;  %v1128_v19 = vpop.permute.xlu2 %1127  ;;  %325 = vst [vmem:[#allocation2 + $0x40] sm:$0x1] %v324_v35 }
  0xca   : > { %v719_v26 = vld [vmem:[#allocation2 + $0x38] sm:$0xf] }
  0xcb   : > { %v720_v61 = vsel %vm3330_vm13, %v3408_v5, %v719_v26  ;;  %v538_v5 = vrot.slane %v3526_v22, 4 }
  0xcc   : > { %v810_v3 = vpop.permute.xlu1 %809  ;;  %v1124_v0 = vpop.permute.xlu0 %1123  ;;  %721 = vst [vmem:[#allocation2 + $0x38] sm:$0xf] %v720_v61 }
  0xcd   : > { %897 = vst.msk [vmem:[#allocation2 + $0x2c] sm:$0xf] %vm887_vm14, %v810_v3  ;;  %v2919_v52 = vld [vmem:[#allocation2 + $0x20] sm:$0xff]  ;;  %v546_v22 = vsel %vm3303_vm11, %v538_v5, %v3533_v30 }
  0xce   : > { %1222 = vst.msk [vmem:[#allocation2 + $0x78] sm:$0xf] %vm1163_vm4, %v1124_v0  ;;  %2865 = vmatmul.msk.bf16.gmra.mxu2 %vm1392_vm3, %v2919_v52  ;;  %v2903_v45 = vld [vmem:[#allocation2 + $0x20] sm:$0xff] }
  0xcf   : > { %v2887_v7 = vld [vmem:[#allocation2 + $0x20] sm:$0xff] }
  0xd0   : > { %v812_v54 = vpop.permute.xlu2 %811  ;;  %v723_v3 = vld [vmem:[#allocation2 + $0x40] sm:$0xf] }
  0xd1   : > { %898 = vst.msk [vmem:[#allocation2 + $0x30] sm:$0xf] %vm887_vm14, %v812_v54  ;;  %v724_v34 = vsel %vm3330_vm13, %v3469_v36, %v723_v3  ;;  %v327_v54 = vsel %vm3277_vm5, 0, %v326_v38 }
  0xd2   : > { %725 = vst [vmem:[#allocation2 + $0x40] sm:$0xf] %v724_v34 }
  0xd3   : > { %328 = vst [vmem:[#allocation2 + $0x48] sm:$0x1] %v327_v54 }
  0xd4   : > { %v852_v18 = vpop.permute.xlu1 %851  ;;  %v808_v55 = vpop.permute.xlu0 %807  ;;  %v1183_v14 = vld [vmem:[#allocation2 + $0x2c] sm:$0xf] }
  0xd5   : > { %918 = vst.msk [vmem:[#allocation2 + $0x80] sm:$0xf] %vm887_vm14, %v852_v18  ;;  %v1184_v32 = vsel %vm3503_vm6, %v1086_v12, %v1183_v14  ;;  %v2914_v20 = vld [vmem:[#allocation2 + $0x78] sm:$0xff]  ;;  %v375_v12 = vsel %vm3286_vm8, 0, %v374_v16 }
  0xd6   : > { %896 = vst.msk [vmem:[#allocation2 + $0x28] sm:$0xf] %vm887_vm14, %v808_v55  ;;  %2675 = vmatmul.msk.bf16.gmra.mxu3 %vm1392_vm3, %v2914_v20 }
  0xd7   : > { %1185 = vst [vmem:[#allocation2 + $0x2c] sm:$0xf] %v1184_v32  ;;  %2664 = vmatmul.msk.bf16.gmra.mxu0 %vm1392_vm3, %v2903_v45 }
  0xd8   : > { %2749 = vmatmul.msk.bf16.gmra.mxu1 %vm1392_vm3, %v2887_v7  ;;  %1226 = vst.msk [vmem:[#allocation2 + $0x80] sm:$0xf] %vm1163_vm4, %v1128_v19  ;;  %v1114_v9 = vpop.permute.xlu2 %1113  ;;  %v378_v19 = vsel %vm3286_vm8, 0, %v377_v27 }
  0xd9   : > { %376 = vst [vmem:[#allocation2 + $0x44] sm:$0x8] %v375_v12  ;;  %v329_v12 = vld [vmem:[#allocation2 + $0x50] sm:$0x1] }
  0xda   : > { %726 = vst.msk [vmem:[#allocation2 + $0x44] sm:$0xf] %vm691_vm10, %v530_v46  ;;  %v727_v7 = vld [vmem:[#allocation2 + $0x48] sm:$0xf]  ;;  %v330_v26 = vsel %vm3277_vm5, 0, %v329_v12 }
  0xdb   : > { %379 = vst [vmem:[#allocation2 + $0x4c] sm:$0x8] %v378_v19 }
  0xdc   : > { %v1084_v59 = vpop.permute.xlu1 %1083  ;;  %v1130_v56 = vpop.permute.xlu0 %1129  ;;  %730 = vst.msk [vmem:[#allocation2 + $0x4c] sm:$0xf] %vm691_vm10, %v546_v22 }
  0xdd   : > { %1182 = vst.msk [vmem:[#allocation2 + $0x28] sm:$0xf] %vm1163_vm4, %v1084_v59  ;;  %v1228_v10 = vsel %vm3503_vm6, %v1130_v56, %v1227_v43  ;;  %v728_v43 = vsel %vm3330_vm13, %v3536_v15, %v727_v7  ;;  %v381_v15 = vsel %vm3286_vm8, 0, %v380_v21 }
  0xde   : > { %1229 = vst [vmem:[#allocation2 + $0x84] sm:$0xf] %v1228_v10 }
  0xdf   : > { %729 = vst [vmem:[#allocation2 + $0x48] sm:$0xf] %v728_v43 }
  0xe0   : > { %v818_v4 = vpop.permute.xlu2 %817  ;;  %382 = vst [vmem:[#allocation2 + $0x54] sm:$0x8] %v381_v15 }
  0xe1   : > { %901 = vst.msk [vmem:[#allocation2 + $0x3c] sm:$0xf] %vm887_vm14, %v818_v4 }
  0xe2   : > { %734 = vst.msk [vmem:[#allocation2 + $0x54] sm:$0xf] %vm691_vm10, %v562_v40 }
  0xe3   : > { %331 = vst [vmem:[#allocation2 + $0x50] sm:$0x1] %v330_v26 }
  0xe4   : > { %v838_v17 = vpop.permute.xlu1 %837  ;;  %v814_v41 = vpop.permute.xlu0 %813  ;;  %v2920_v51 = vld [vmem:[#allocation2 + $0x28] sm:$0xff] }
  0xe5   : > { %v2904_v58 = vld [vmem:[#allocation2 + $0x28] sm:$0xff]  ;;  %911 = vst.msk [vmem:[#allocation2 + $0x64] sm:$0xf] %vm887_vm14, %v838_v17  ;;  %v2915_v13 = vld [vmem:[#allocation2 + $0x80] sm:$0xff]  ;;  %2866 = vmatmul.msk.bf16.gmra.mxu2 %vm1392_vm3, %v2920_v51 }
  0xe6   : > { %v2888_v44 = vld [vmem:[#allocation2 + $0x28] sm:$0xff]  ;;  %899 = vst.msk [vmem:[#allocation2 + $0x34] sm:$0xf] %vm887_vm14, %v814_v41  ;;  %2676 = vmatmul.msk.bf16.gmra.mxu3 %vm1392_vm3, %v2915_v13 }
  0xe7   : > { %2665 = vmatmul.msk.bf16.gmra.mxu0 %vm1392_vm3, %v2904_v58  ;;  %v570_v58 = vrot.slane %v3650_v37, 4  ;;  %v384_v37 = vsel %vm3286_vm8, 0, %v383_v29 }
  0xe8   : > { %2750 = vmatmul.msk.bf16.gmra.mxu1 %vm1392_vm3, %v2888_v44  ;;  %v1092_v23 = vpop.permute.xlu2 %1091  ;;  %v1191_v30 = vld [vmem:[#allocation2 + $0x3c] sm:$0xf]  ;;  %385 = vst [vmem:[#allocation2 + $0x5c] sm:$0x8] %v384_v37 }
  0xe9   : > { %v578_v35 = vsel %vm3303_vm11, %v570_v58, %v3721_v2  ;;  %vm2257_vm11 = vcmask 31744  }
  0xea   : > { %v731_v13 = vld [vmem:[#allocation2 + $0x50] sm:$0xf]  ;;  %738 = vst.msk [vmem:[#allocation2 + $0x5c] sm:$0xf] %vm691_vm10, %v578_v35 }
  0xec   : > { %v1090_v53 = vpop.permute.xlu1 %1089  ;;  %v836_v28 = vpop.permute.xlu0 %835  ;;  %v1211_v25 = vld [vmem:[#allocation2 + $0x64] sm:$0xf] }
  0xed   : > { %v1187_v63 = vld [vmem:[#allocation2 + $0x34] sm:$0xf]  ;;  %910 = vst.msk [vmem:[#allocation2 + $0x60] sm:$0xf] %vm887_vm14, %v836_v28  ;;  %v1212_v62 = vsel %vm3503_vm6, %v1114_v9, %v1211_v25  ;;  %v2896_v9 = vld [vmem:[#allocation2 + $0x68] sm:$0xff] }
  0xee   : > { %v1188_v33 = vsel %vm3503_vm6, %v1090_v53, %v1187_v63  ;;  %1213 = vst [vmem:[#allocation2 + $0x64] sm:$0xf] %v1212_v62  ;;  %v732_v53 = vsel %vm3330_vm13, %v3617_v60, %v731_v13  ;;  %v332_v62 = vld [vmem:[#allocation2 + $0x58] sm:$0x1] }
  0xef   : > { %1189 = vst [vmem:[#allocation2 + $0x34] sm:$0xf] %v1188_v33  ;;  %v2897_v33 = vld [vmem:[#allocation2 + $0x70] sm:$0xff]  ;;  %v333_v49 = vsel %vm3277_vm5, 0, %v332_v62 }
  0xf0   : > { %v1098_v47 = vpop.permute.xlu2 %1097  ;;  %v1679_v17 = vpop.f32.mrf.mxu1  ;;  %733 = vst [vmem:[#allocation2 + $0x50] sm:$0xf] %v732_v53 }
  0xf1   : > { %334 = vst [vmem:[#allocation2 + $0x58] sm:$0x1] %v333_v49 }
  0xf4   : > { %v1112_v0 = vpop.permute.xlu1 %1111  ;;  %v1088_v52 = vpop.permute.xlu0 %1087 }
  0xf5   : > { %1210 = vst.msk [vmem:[#allocation2 + $0x60] sm:$0xf] %vm1163_vm4, %v1112_v0 }
  0xf6   : > { %1186 = vst.msk [vmem:[#allocation2 + $0x30] sm:$0xf] %vm1163_vm4, %v1088_v52 }
  0xf8   : > { %v824_v24 = vpop.permute.xlu2 %823  ;;  %v1681_v2 = vpop.f32.mrf.mxu1  ;;  %v735_v38 = vld [vmem:[#allocation2 + $0x58] sm:$0xf] }
  0xf9   : > { %904 = vst.msk [vmem:[#allocation2 + $0x48] sm:$0xf] %vm887_vm14, %v824_v24  ;;  %v736_v54 = vsel %vm3330_vm13, %v3658_v8, %v735_v38 }
  0xfa   : > { %737 = vst [vmem:[#allocation2 + $0x58] sm:$0xf] %v736_v54 }
  0xfc   : > { %v2895_v18 = vld [vmem:[#allocation2 + $0x60] sm:$0xff]  ;;  %v1094_v55 = vpop.permute.xlu1 %1093  ;;  %v816_v14 = vpop.permute.xlu0 %815 }
  0xfd   : > { %v2905_v32 = vld [vmem:[#allocation2 + $0x30] sm:$0xff]  ;;  %v1192_v36 = vsel %vm3503_vm6, %v1094_v55, %v1191_v30  ;;  %900 = vst.msk [vmem:[#allocation2 + $0x38] sm:$0xf] %vm887_vm14, %v816_v14  ;;  %2757 = vmatmul.msk.bf16.vlgmr.msrb.gmra.mxu3 %vm1392_vm3, %v2895_v18  ;;  %v3856_v30 = vld [vmem:[%s4204_s2] ss:$0 sm:$0xff] }
  0xfe   : > { %v2889_v20 = vld [vmem:[#allocation2 + $0x30] sm:$0xff]  ;;  %1193 = vst [vmem:[#allocation2 + $0x3c] sm:$0xf] %v1192_v36  ;;  %2666 = vmatmul.msk.bf16.gmra.mxu0 %vm1392_vm3, %v2905_v32 }
  0xff   : > { %v2921_v45 = vld [vmem:[#allocation2 + $0x30] sm:$0xff]  ;;  %2751 = vmatmul.msk.bf16.gmra.mxu1 %vm1392_vm3, %v2889_v20  ;;  %1190 = vst.msk [vmem:[#allocation2 + $0x38] sm:$0xf] %vm1163_vm4, %v1092_v23  ;;  %v2898_v20 = vld [vmem:[#allocation2 + $0x78] sm:$0xff] }
 0x100   : > { %2867 = vmatmul.msk.bf16.gmra.mxu2 %vm1392_vm3, %v2921_v45  ;;  %v830_v6 = vpop.permute.xlu2 %829 }
 0x101   : > { %907 = vst.msk [vmem:[#allocation2 + $0x54] sm:$0xf] %vm887_vm14, %v830_v6 }
 0x104   : > { %v822_v57 = vpop.permute.xlu0 %821  ;;  %v820_v42 = vpop.permute.xlu1 %819 }
 0x105   : > { %903 = vst.msk [vmem:[#allocation2 + $0x44] sm:$0xf] %vm887_vm14, %v822_v57 }
 0x106   : > { %902 = vst.msk [vmem:[#allocation2 + $0x40] sm:$0xf] %vm887_vm14, %v820_v42  ;;  %v2906_v59 = vld [vmem:[#allocation2 + $0x38] sm:$0xff] }
 0x107   : > { %v2890_v56 = vld [vmem:[#allocation2 + $0x38] sm:$0xff] }
 0x108   : > { %v2922_v10 = vld [vmem:[#allocation2 + $0x38] sm:$0xff]  ;;  %v1203_v5 = vld [vmem:[#allocation2 + $0x54] sm:$0xf]  ;;  %v1104_v63 = vpop.permute.xlu2 %1103 }
 0x10c   : > { %v1195_v16 = vld [vmem:[#allocation2 + $0x44] sm:$0xf]  ;;  %v1096_v46 = vpop.permute.xlu0 %1095  ;;  %v826_v11 = vpop.permute.xlu1 %825 }
 0x10d   : > { %v1196_v4 = vsel %vm3503_vm6, %v1098_v47, %v1195_v16  ;;  %1194 = vst.msk [vmem:[#allocation2 + $0x40] sm:$0xf] %vm1163_vm4, %v1096_v46  ;;  %2758 = vmatmul.msk.bf16.gmra.mxu3 %vm1392_vm3, %v2896_v9 }
 0x10e   : > { %1197 = vst [vmem:[#allocation2 + $0x44] sm:$0xf] %v1196_v4  ;;  %2667 = vmatmul.msk.bf16.gmra.mxu0 %vm1392_vm3, %v2906_v59  ;;  %v2929_v4 = vld [vmem:[#allocation2 + $0x70] sm:$0xff] }
 0x10f   : > { %2752 = vmatmul.msk.bf16.gmra.mxu1 %vm1392_vm3, %v2890_v56  ;;  %905 = vst.msk [vmem:[#allocation2 + $0x4c] sm:$0xf] %vm887_vm14, %v826_v11 }
 0x110   : > { %2868 = vmatmul.msk.bf16.gmra.mxu2 %vm1392_vm3, %v2922_v10 }
 0x113   : > { %v1110_v55 = vpop.permute.xlu2 %1109 }
 0x114   : > { %v1102_v41 = vpop.permute.xlu0 %1101  ;;  %v1100_v51 = vpop.permute.xlu1 %1099 }
 0x115   : > { %1198 = vst.msk [vmem:[#allocation2 + $0x48] sm:$0xf] %vm1163_vm4, %v1100_v51  ;;  %v2907_v28 = vld [vmem:[#allocation2 + $0x40] sm:$0xff] }
 0x116   : > { %v1199_v44 = vld [vmem:[#allocation2 + $0x4c] sm:$0xf]  ;;  %v2891_v25 = vld [vmem:[#allocation2 + $0x40] sm:$0xff] }
 0x117   : > { %v1200_v61 = vsel %vm3503_vm6, %v1102_v41, %v1199_v44  ;;  %v2923_v27 = vld [vmem:[#allocation2 + $0x40] sm:$0xff] }
 0x118   : > { %1201 = vst [vmem:[#allocation2 + $0x4c] sm:$0xf] %v1200_v61 }
 0x11c   : > { %v1106_v22 = vpop.permute.xlu1 %1105  ;;  %v828_v19 = vpop.permute.xlu0 %827 }
 0x11d   : > { %v1204_v50 = vsel %vm3503_vm6, %v1106_v22, %v1203_v5  ;;  %906 = vst.msk [vmem:[#allocation2 + $0x50] sm:$0xf] %vm887_vm14, %v828_v19  ;;  %2759 = vmatmul.msk.bf16.gmra.mxu3 %vm1392_vm3, %v2897_v33  ;;  %v2930_v33 = vld [vmem:[#allocation2 + $0x78] sm:$0xff] }
 0x11e   : > { %1205 = vst [vmem:[#allocation2 + $0x54] sm:$0xf] %v1204_v50  ;;  %2668 = vmatmul.msk.bf16.gmra.mxu0 %vm1392_vm3, %v2907_v28 }
 0x11f   : > { %2753 = vmatmul.msk.bf16.gmra.mxu1 %vm1392_vm3, %v2891_v25  ;;  %1202 = vst.msk [vmem:[#allocation2 + $0x50] sm:$0xf] %vm1163_vm4, %v1104_v63  ;;  %v2908_v14 = vld [vmem:[#allocation2 + $0x48] sm:$0xff] }
 0x120   : > { %2869 = vmatmul.msk.bf16.gmra.mxu2 %vm1392_vm3, %v2923_v27  ;;  %v1943_v23 = vpop.f32.mrf.mxu2  ;;  %v2892_v32 = vld [vmem:[#allocation2 + $0x48] sm:$0xff] }
 0x121   : > { %v2924_v45 = vld [vmem:[#allocation2 + $0x48] sm:$0xff]  ;;  %v3874_v10 = vpop.f32.mrf.mxu3 }
 0x124   : > { %v834_v60 = vpop.permute.xlu0 %833  ;;  %v1454_v3 = vpop.f32.mrf.mxu0 }
 0x125   : > { %909 = vst.msk [vmem:[#allocation2 + $0x5c] sm:$0xf] %vm887_vm14, %v834_v60  ;;  %v1680_v0 = vadd.f32 %v1679_v17, %v1454_v3  ;;  %v1684_v34 = vpop.f32.mrf.mxu1  ;;  %v832_v47 = vpop.permute.xlu1 %831 }
 0x126   : > { %908 = vst.msk [vmem:[#allocation2 + $0x58] sm:$0xf] %vm887_vm14, %v832_v47  ;;  %v2909_v16 = vld [vmem:[#allocation2 + $0x50] sm:$0xff]  ;;  %vm2418_vm14 = vcmask 97312  }
 0x127   : > { %v2023_v52 = vadd.f32 %v1943_v23, %v1680_v0  ;;  %v2893_v46 = vld [vmem:[#allocation2 + $0x50] sm:$0xff] }
 0x128   : > { %v1945_v43 = vpop.f32.mrf.mxu2  ;;  %v2925_v12 = vld [vmem:[#allocation2 + $0x50] sm:$0xff] }
 0x129   : > { %v2059_v18 = vmul.f32 %v3851_v31, %v2023_v52  ;;  %v3881_v26 = vpop.f32.mrf.mxu3 }
 0x12b   : > { %v2095_v36 = vadd.f32 %v3856_v30, %v2059_v18 }
 0x12c   : > { %v1207_v7 = vld [vmem:[#allocation2 + $0x5c] sm:$0xf]  ;;  %v1108_v24 = vpop.permute.xlu0 %1107  ;;  %v1456_v57 = vpop.f32.mrf.mxu0 }
 0x12d   : > { %v1208_v42 = vsel %vm3503_vm6, %v1110_v55, %v1207_v7  ;;  %1206 = vst.msk [vmem:[#allocation2 + $0x58] sm:$0xf] %vm1163_vm4, %v1108_v24  ;;  %v1682_v1 = vadd.f32 %v1681_v2, %v1456_v57  ;;  %2760 = vmatmul.msk.bf16.gmra.mxu3 %vm1392_vm3, %v2898_v20  ;;  %vm2127_vm0 = vcmp.ge.f32.partialorder %v2095_v36, 0.0  ;;  %v2159_v8 = vmul.f32 0.01, %v2095_v36  ;;  %v1686_v21 = vpop.f32.mrf.mxu1  ;;  %v2911_v7 = vld [vmem:[#allocation2 + $0x60] sm:$0xff] }
 0x12e   : > { %1209 = vst [vmem:[#allocation2 + $0x5c] sm:$0xf] %v1208_v42  ;;  %2669 = vmatmul.msk.bf16.gmra.mxu0 %vm1392_vm3, %v2908_v14  ;;  %v2927_v24 = vld [vmem:[#allocation2 + $0x60] sm:$0xff] }
 0x12f   : > { %2754 = vmatmul.msk.bf16.gmra.mxu1 %vm1392_vm3, %v2892_v32  ;;  %v2024_v39 = vadd.f32 %v1945_v43, %v1682_v1  ;;  %v2191_v9 = vsel %vm2127_vm0, %v2095_v36, %v2159_v8 }
 0x130   : > { %2870 = vmatmul.msk.bf16.gmra.mxu2 %vm1392_vm3, %v2924_v45  ;;  %2322 = vrot.lane.b32.xlu1 %v2191_v9, %s2990_s23  ;;  %v2931_v45 = vld [vmem:[#allocation2 + $0x80] sm:$0xff] }
 0x131   : > { %v2060_v48 = vmul.f32 %v3851_v31, %v2024_v39 }
 0x133   : > { %v2096_v40 = vadd.f32 %v3856_v30, %v2060_v48 }
 0x134   : > { %v1459_v59 = vpop.f32.mrf.mxu0 }
 0x135   : > { %vm2128_vm2 = vcmp.ge.f32.partialorder %v2096_v40, 0.0  ;;  %v2160_v56 = vmul.f32 0.01, %v2096_v40  ;;  %v1689_v11 = vpop.f32.mrf.mxu1  ;;  %v1685_v17 = vadd.f32 %v1684_v34, %v1459_v59  ;;  %v2910_v25 = vld [vmem:[#allocation2 + $0x58] sm:$0xff]  ;;  %v2932_v59 = vld [vmem:[#allocation2 + $0x88] sm:$0xff] }
 0x136   : > { %v2894_v63 = vld [vmem:[#allocation2 + $0x58] sm:$0xff] }
 0x137   : > { %v2192_v15 = vsel %vm2128_vm2, %v2096_v40, %v2160_v56  ;;  %v2926_v62 = vld [vmem:[#allocation2 + $0x58] sm:$0xff] }
 0x138   : > { %2324 = vrot.lane.b32.xlu2 %v2192_v15, %s2990_s23 }
 0x13c   : > { %v1461_v6 = vpop.f32.mrf.mxu0 }
 0x13d   : > { %2875 = vmatmul.msk.bf16.vlgmr.msra.gmra.mxu3 %vm1392_vm3, %v2929_v4  ;;  %v1691_v61 = vpop.f32.mrf.mxu1  ;;  %v1687_v29 = vadd.f32 %v1686_v21, %v1461_v6 }
 0x13e   : > { %2670 = vmatmul.msk.bf16.gmra.mxu0 %vm1392_vm3, %v2909_v16 }
 0x13f   : > { %2755 = vmatmul.msk.bf16.gmra.mxu1 %vm1392_vm3, %v2893_v46  ;;  %v2928_v46 = vld [vmem:[#allocation2 + $0x68] sm:$0xff] }
 0x140   : > { %2871 = vmatmul.msk.bf16.gmra.mxu2 %vm1392_vm3, %v2925_v12  ;;  %v3885_v35 = vpop.f32.mrf.mxu3 }
 0x141   : > { %v1948_v41 = vpop.f32.mrf.mxu2 }
 0x142   : > { %v2025_v51 = vadd.f32 %v1948_v41, %v1685_v17 }
 0x144   : > { %v2061_v58 = vmul.f32 %v3851_v31, %v2025_v51  ;;  %v1464_v44 = vpop.f32.mrf.mxu0  ;;  %v2226_v51 = vld [vmem:[%s3044_s22 + $0x8] sm:$0xff] }
 0x145   : > { %v1694_v50 = vpop.f32.mrf.mxu1  ;;  %v1690_v2 = vadd.f32 %v1689_v11, %v1464_v44  ;;  %2259 = vst.msk [vmem:[%s3921_s24 + $0x8] sm:$0xff] %vm2257_vm11, %v2226_v51 }
 0x146   : > { %v2097_v13 = vadd.f32 %v3856_v30, %v2061_v58 }
 0x148   : > { %vm2129_vm5 = vcmp.ge.f32.partialorder %v2097_v13, 0.0  ;;  %v2161_v5 = vmul.f32 0.01, %v2097_v13  ;;  %v3894_v23 = vpop.f32.mrf.mxu3 }
 0x149   : > { %v1950_v53 = vpop.f32.mrf.mxu2 }
 0x14a   : > { %v2026_v37 = vadd.f32 %v1950_v53, %v1687_v29  ;;  %v2193_v28 = vsel %vm2129_vm5, %v2097_v13, %v2161_v5 }
 0x14b   : > { %2326 = vrot.lane.b32.xlu0 %v2193_v28, %s2990_s23 }
 0x14c   : > { %v2062_v27 = vmul.f32 %v3851_v31, %v2026_v37  ;;  %v1466_v22 = vpop.f32.mrf.mxu0 }
 0x14d   : > { %2876 = vmatmul.msk.bf16.gmra.mxu3 %vm1392_vm3, %v2930_v33  ;;  %v1692_v47 = vadd.f32 %v1691_v61, %v1466_v22  ;;  %v1696_v18 = vpop.f32.mrf.mxu1  ;;  %v2225_v33 = vld [vmem:[%s3044_s22] sm:$0xff] }
 0x14e   : > { %v2098_v19 = vadd.f32 %v3856_v30, %v2062_v27  ;;  %2671 = vmatmul.msk.bf16.gmra.mxu0 %vm1392_vm3, %v2910_v25  ;;  %2258 = vst.msk [vmem:[%s3921_s24] sm:$0xff] %vm2257_vm11, %v2225_v33 }
 0x14f   : > { %2756 = vmatmul.msk.bf16.gmra.mxu1 %vm1392_vm3, %v2894_v63 }
 0x150   : > { %2872 = vmatmul.msk.bf16.gmra.mxu2 %vm1392_vm3, %v2926_v62  ;;  %vm2130_vm7 = vcmp.ge.f32.partialorder %v2098_v19, 0.0  ;;  %v2162_v49 = vmul.f32 0.01, %v2098_v19 }
 0x151   : > { %v1953_v60 = vpop.f32.mrf.mxu2 }
 0x152   : > { %v2027_v3 = vadd.f32 %v1953_v60, %v1690_v2  ;;  %v2194_v0 = vsel %vm2130_vm7, %v2098_v19, %v2162_v49 }
 0x153   : > { %2328 = vrot.lane.b32.xlu1 %v2194_v0, %s2990_s23 }
 0x154   : > { %v2063_v52 = vmul.f32 %v3851_v31, %v2027_v3  ;;  %v1469_v34 = vpop.f32.mrf.mxu0 }
 0x155   : > { %v1699_v43 = vpop.f32.mrf.mxu1  ;;  %v1695_v9 = vadd.f32 %v1694_v50, %v1469_v34 }
 0x156   : > { %v2099_v38 = vadd.f32 %v3856_v30, %v2063_v52 }
 0x158   : > { %vm2131_vm8 = vcmp.ge.f32.partialorder %v2099_v38, 0.0  ;;  %v2163_v54 = vmul.f32 0.01, %v2099_v38 }
 0x159   : > { %v1955_v55 = vpop.f32.mrf.mxu2  ;;  %v3899_v14 = vpop.f32.mrf.mxu3 }
 0x15a   : > { %v2028_v32 = vadd.f32 %v1955_v55, %v1692_v47  ;;  %v2195_v20 = vsel %vm2131_vm8, %v2099_v38, %v2163_v54 }
 0x15b   : > { %2330 = vrot.lane.b32.xlu2 %v2195_v20, %s2990_s23 }
 0x15c   : > { %v2064_v36 = vmul.f32 %v3851_v31, %v2028_v32  ;;  %v1471_v42 = vpop.f32.mrf.mxu0 }
 0x15d   : > { %2877 = vmatmul.msk.bf16.gmra.mxu3 %vm1392_vm3, %v2931_v45  ;;  %v1701_v15 = vpop.f32.mrf.mxu1  ;;  %v1697_v12 = vadd.f32 %v1696_v18, %v1471_v42 }
 0x15e   : > { %v2100_v57 = vadd.f32 %v3856_v30, %v2064_v36  ;;  %2672 = vmatmul.msk.bf16.gmra.mxu0 %vm1392_vm3, %v2911_v7 }
 0x160   : > { %2873 = vmatmul.msk.bf16.gmra.mxu2 %vm1392_vm3, %v2927_v24  ;;  %vm2132_vm9 = vcmp.ge.f32.partialorder %v2100_v57, 0.0  ;;  %v2164_v1 = vmul.f32 0.01, %v2100_v57 }
 0x161   : > { %v3908_v39 = vpop.f32.mrf.mxu3 }
 0x162   : > { %v2196_v8 = vsel %vm2132_vm9, %v2100_v57, %v2164_v1  ;;  %v2229_v1 = vld [vmem:[%s3044_s22 + $0x20] sm:$0xff] }
 0x163   : > { %2332 = vrot.lane.b32.xlu0 %v2196_v8, %s2990_s23  ;;  %2262 = vst.msk [vmem:[%s3921_s24 + $0x20] sm:$0xff] %vm2257_vm11, %v2229_v1 }
 0x164   : > { %v1474_v21 = vpop.f32.mrf.mxu0 }
 0x165   : > { %v1704_v13 = vpop.f32.mrf.mxu1  ;;  %v1700_v25 = vadd.f32 %v1699_v43, %v1474_v21 }
 0x168   : > { %v1958_v48 = vpop.f32.mrf.mxu2 }
 0x169   : > { %v2029_v40 = vadd.f32 %v1958_v48, %v1695_v9  ;;  %v3913_v11 = vpop.f32.mrf.mxu3 }
 0x16b   : > { %v2065_v56 = vmul.f32 %v3851_v31, %v2029_v40 }
 0x16c   : > { %v1476_v58 = vpop.f32.mrf.mxu0 }
 0x16d   : > { %v2101_v16 = vadd.f32 %v3856_v30, %v2065_v56  ;;  %2878 = vmatmul.msk.bf16.gmra.mxu3 %vm1392_vm3, %v2932_v59  ;;  %v1706_v63 = vpop.f32.mrf.mxu1  ;;  %v1702_v49 = vadd.f32 %v1701_v15, %v1476_v58 }
 0x16f   : > { %vm2133_vm10 = vcmp.ge.f32.partialorder %v2101_v16, 0.0  ;;  %v2165_v4 = vmul.f32 0.01, %v2101_v16 }
 0x170   : > { %2874 = vmatmul.msk.bf16.gmra.mxu2 %vm1392_vm3, %v2928_v46  ;;  %v1960_v6 = vpop.f32.mrf.mxu2  ;;  %v2227_v46 = vld [vmem:[%s3044_s22 + $0x10] sm:$0xff] }
 0x171   : > { %v2030_v17 = vadd.f32 %v1960_v6, %v1697_v12  ;;  %v2197_v41 = vsel %vm2133_vm10, %v2101_v16, %v2165_v4  ;;  %v3929_v5 = vpop.f32.mrf.mxu3  ;;  %2260 = vst.msk [vmem:[%s3921_s24 + $0x10] sm:$0xff] %vm2257_vm11, %v2227_v46 }
 0x172   : > { %2334 = vrot.lane.b32.xlu1 %v2197_v41, %s2990_s23 }
 0x173   : > { %v2066_v44 = vmul.f32 %v3851_v31, %v2030_v17 }
 0x175   : > { %v2102_v61 = vadd.f32 %v3856_v30, %v2066_v44 }
 0x177   : > { %vm2134_vm12 = vcmp.ge.f32.partialorder %v2102_v61, 0.0  ;;  %v2166_v29 = vmul.f32 0.01, %v2102_v61 }
 0x179   : > { %v2198_v53 = vsel %vm2134_vm12, %v2102_v61, %v2166_v29  ;;  %v2228_v29 = vld [vmem:[%s3044_s22 + $0x18] sm:$0xff] }
 0x17a   : > { %2336 = vrot.lane.b32.xlu2 %v2198_v53, %s2990_s23  ;;  %2261 = vst.msk [vmem:[%s3921_s24 + $0x18] sm:$0xff] %vm2257_vm11, %v2228_v29 }
 0x17b   : > { %v1479_v37 = vpop.f32.mrf.mxu0 }
 0x17c   : > { %v1709_v60 = vpop.f32.mrf.mxu1  ;;  %v1705_v55 = vadd.f32 %v1704_v13, %v1479_v37 }
 0x180   : > { %v3932_v28 = vpop.f32.mrf.mxu3 }
 0x183   : > { %v1963_v62 = vpop.f32.mrf.mxu2  ;;  %v1481_v22 = vpop.f32.mrf.mxu0 }
 0x184   : > { %v2031_v27 = vadd.f32 %v1963_v62, %v1700_v25  ;;  %v1711_v36 = vpop.f32.mrf.mxu1  ;;  %v1707_v9 = vadd.f32 %v1706_v63, %v1481_v22 }
 0x186   : > { %v2067_v19 = vmul.f32 %v3851_v31, %v2031_v27 }
 0x188   : > { %v2103_v50 = vadd.f32 %v3856_v30, %v2067_v19  ;;  %v3939_v2 = vpop.f32.mrf.mxu3 }
 0x18a   : > { %vm2135_vm13 = vcmp.ge.f32.partialorder %v2103_v50, 0.0  ;;  %v2167_v3 = vmul.f32 0.01, %v2103_v50 }
 0x18b   : > { %v1965_v0 = vpop.f32.mrf.mxu2  ;;  %v1484_v34 = vpop.f32.mrf.mxu0 }
 0x18c   : > { %v2032_v52 = vadd.f32 %v1965_v0, %v1702_v49  ;;  %v2199_v38 = vsel %vm2135_vm13, %v2103_v50, %v2167_v3  ;;  %v1714_v15 = vpop.f32.mrf.mxu1  ;;  %v1710_v6 = vadd.f32 %v1709_v60, %v1484_v34 }
 0x18d   : > { %2338 = vrot.lane.b32.xlu0 %v2199_v38, %s2990_s23 }
 0x18e   : > { %v2068_v47 = vmul.f32 %v3851_v31, %v2032_v52 }
 0x190   : > { %v2104_v54 = vadd.f32 %v3856_v30, %v2068_v47  ;;  %v3944_v18 = vpop.f32.mrf.mxu3 }
 0x192   : > { %vm2136_vm15 = vcmp.ge.f32.partialorder %v2104_v54, 0.0  ;;  %v2168_v32 = vmul.f32 0.01, %v2104_v54  ;;  %v2325_v45 = vpop.permute.xlu2 %2324 }
 0x193   : > { %v1968_v20 = vpop.f32.mrf.mxu2  ;;  %2420 = vst.msk [vmem:[%s3921_s24 + $0x8] sm:$0xff] %vm2418_vm14, %v2325_v45  ;;  %v1486_v24 = vpop.f32.mrf.mxu0 }
 0x194   : > { %v2033_v7 = vadd.f32 %v1968_v20, %v1705_v55  ;;  %v2200_v57 = vsel %vm2136_vm15, %v2104_v54, %v2168_v32  ;;  %v1716_v53 = vpop.f32.mrf.mxu1  ;;  %v1712_v63 = vadd.f32 %v1711_v36, %v1486_v24  ;;  %v2232_v32 = vld [vmem:[%s3044_s22 + $0x38] sm:$0xff]  ;;  %v2230_v20 = vld [vmem:[%s3044_s22 + $0x28] sm:$0xff] }
 0x195   : > { %2340 = vrot.lane.b32.xlu1 %v2200_v57, %s2990_s23  ;;  %2265 = vst.msk [vmem:[%s3921_s24 + $0x38] sm:$0xff] %vm2257_vm11, %v2232_v32 }
 0x196   : > { %v2069_v42 = vmul.f32 %v3851_v31, %v2033_v7  ;;  %2263 = vst.msk [vmem:[%s3921_s24 + $0x28] sm:$0xff] %vm2257_vm11, %v2230_v20 }
 0x198   : > { %v2105_v8 = vadd.f32 %v3856_v30, %v2069_v42  ;;  %v3954_v43 = vpop.f32.mrf.mxu3 }
 0x19a   : > { %vm2137_vm1 = vcmp.ge.f32.partialorder %v2105_v8, 0.0  ;;  %v2169_v48 = vmul.f32 0.01, %v2105_v8 }
 0x19b   : > { %v1970_v21 = vpop.f32.mrf.mxu2  ;;  %v1489_v59 = vpop.f32.mrf.mxu0 }
 0x19c   : > { %v2034_v40 = vadd.f32 %v1970_v21, %v1707_v9  ;;  %v2201_v56 = vsel %vm2137_vm1, %v2105_v8, %v2169_v48  ;;  %v1719_v0 = vpop.f32.mrf.mxu1 }
 0x19d   : > { %2342 = vrot.lane.b32.xlu2 %v2201_v56, %s2990_s23 }
 0x19e   : > { %v2070_v16 = vmul.f32 %v3851_v31, %v2034_v40  ;;  %v1740_v40 = vadd.f32 %v3932_v28, %v3874_v10 }
 0x1a0   : > { %v2106_v12 = vadd.f32 %v3856_v30, %v2070_v16  ;;  %v3962_v4 = vpop.f32.mrf.mxu3 }
 0x1a2   : > { %vm2138_vm3 = vcmp.ge.f32.partialorder %v2106_v12, 0.0  ;;  %v2170_v17 = vmul.f32 0.01, %v2106_v12  ;;  %v2323_v51 = vpop.permute.xlu1 %2322 }
 0x1a3   : > { %v1973_v41 = vpop.f32.mrf.mxu2  ;;  %2419 = vst.msk [vmem:[%s3921_s24] sm:$0xff] %vm2418_vm14, %v2323_v51  ;;  %v1491_v13 = vpop.f32.mrf.mxu0 }
 0x1a4   : > { %v2035_v58 = vadd.f32 %v1973_v41, %v1710_v6  ;;  %v2202_v44 = vsel %vm2138_vm3, %v2106_v12, %v2170_v17  ;;  %v1717_v7 = vadd.f32 %v1716_v53, %v1491_v13  ;;  %v1721_v1 = vpop.f32.mrf.mxu1  ;;  %v1742_v13 = vadd.f32 %v3939_v2, %v3881_v26 }
 0x1a5   : > { %2344 = vrot.lane.b32.xlu0 %v2202_v44, %s2990_s23 }
 0x1a6   : > { %v2071_v61 = vmul.f32 %v3851_v31, %v2035_v58 }
 0x1a8   : > { %v2107_v37 = vadd.f32 %v3856_v30, %v2071_v61  ;;  %v1751_v25 = vpop.f32.mrf.mxu3  ;;  %v2231_v61 = vld [vmem:[%s3044_s22 + $0x30] sm:$0xff] }
 0x1a9   : > { %v3973_v62 = vadd.f32 %v1751_v25, %v3908_v39  ;;  %v1715_v39 = vadd.f32 %v1714_v15, %v1489_v59  ;;  %2264 = vst.msk [vmem:[%s3921_s24 + $0x30] sm:$0xff] %vm2257_vm11, %v2231_v61 }
 0x1aa   : > { %vm2139_vm4 = vcmp.ge.f32.partialorder %v2107_v37, 0.0  ;;  %v2171_v33 = vmul.f32 0.01, %v2107_v37 }
 0x1ab   : > { %v1975_v27 = vpop.f32.mrf.mxu2  ;;  %v1494_v60 = vpop.f32.mrf.mxu0 }
 0x1ac   : > { %v2036_v22 = vadd.f32 %v1975_v27, %v1712_v63  ;;  %v2203_v19 = vsel %vm2139_vm4, %v2107_v37, %v2171_v33  ;;  %v1720_v15 = vadd.f32 %v1719_v0, %v1494_v60  ;;  %v1724_v58 = vpop.f32.mrf.mxu1 }
 0x1ad   : > { %2346 = vrot.lane.b32.xlu1 %v2203_v19, %s2990_s23 }
 0x1ae   : > { %v2072_v50 = vmul.f32 %v3851_v31, %v2036_v22 }
 0x1b0   : > { %v2108_v49 = vadd.f32 %v3856_v30, %v2072_v50  ;;  %v3978_v3 = vpop.f32.mrf.mxu3 }
 0x1b2   : > { %vm2140_vm6 = vcmp.ge.f32.partialorder %v2108_v49, 0.0  ;;  %v2172_v52 = vmul.f32 0.01, %v2108_v49 }
 0x1b3   : > { %v1978_v34 = vpop.f32.mrf.mxu2  ;;  %v1496_v24 = vpop.f32.mrf.mxu0 }
 0x1b4   : > { %v2037_v38 = vadd.f32 %v1978_v34, %v1715_v39  ;;  %v2204_v47 = vsel %vm2140_vm6, %v2108_v49, %v2172_v52  ;;  %v1722_v37 = vadd.f32 %v1721_v1, %v1496_v24  ;;  %v1745_v39 = vadd.f32 %v3944_v18, %v3885_v35  ;;  %v1726_v0 = vpop.f32.mrf.mxu1  ;;  %v2235_v1 = vld [vmem:[%s3044_s22 + $0x50] sm:$0xff] }
 0x1b5   : > { %2348 = vrot.lane.b32.xlu2 %v2204_v47, %s2990_s23  ;;  %v2331_v55 = vpop.permute.xlu2 %2330  ;;  %2268 = vst.msk [vmem:[%s3921_s24 + $0x50] sm:$0xff] %vm2257_vm11, %v2235_v1 }
 0x1b6   : > { %v2073_v54 = vmul.f32 %v3851_v31, %v2037_v38  ;;  %2423 = vst.msk [vmem:[%s3921_s24 + $0x20] sm:$0xff] %vm2418_vm14, %v2331_v55 }
 0x1b8   : > { %v2109_v45 = vadd.f32 %v3856_v30, %v2073_v54  ;;  %v3989_v36 = vpop.f32.mrf.mxu3 }
 0x1ba   : > { %vm2141_vm0 = vcmp.ge.f32.partialorder %v2109_v45, 0.0  ;;  %v2173_v57 = vmul.f32 0.01, %v2109_v45 }
 0x1bb   : > { %v1980_v42 = vpop.f32.mrf.mxu2  ;;  %v1499_v6 = vpop.f32.mrf.mxu0 }
 0x1bc   : > { %v2038_v8 = vadd.f32 %v1980_v42, %v1717_v7  ;;  %v2205_v9 = vsel %vm2141_vm0, %v2109_v45, %v2173_v57  ;;  %v1725_v38 = vadd.f32 %v1724_v58, %v1499_v6  ;;  %v1750_v58 = vadd.f32 %v3962_v4, %v3899_v14 }
 0x1bd   : > { %2350 = vrot.lane.b32.xlu0 %v2205_v9, %s2990_s23  ;;  %v2327_v21 = vpop.permute.xlu0 %2326 }
 0x1be   : > { %v2074_v48 = vmul.f32 %v3851_v31, %v2038_v8  ;;  %2421 = vst.msk [vmem:[%s3921_s24 + $0x10] sm:$0xff] %vm2418_vm14, %v2327_v21  ;;  %v1747_v8 = vadd.f32 %v3954_v43, %v3894_v23 }
 0x1c0   : > { %v2110_v59 = vadd.f32 %v3856_v30, %v2074_v48  ;;  %v2003_v56 = vpop.f32.mrf.mxu3 }
 0x1c1   : > { %v2047_v16 = vadd.f32 %v2003_v56, %v1740_v40  ;;  %v1729_v56 = vpop.f32.mrf.mxu1 }
 0x1c2   : > { %vm2142_vm2 = vcmp.ge.f32.partialorder %v2110_v59, 0.0  ;;  %v2174_v46 = vmul.f32 0.01, %v2110_v59 }
 0x1c3   : > { %v1983_v12 = vpop.f32.mrf.mxu2  ;;  %v2083_v41 = vmul.f32 %v3851_v31, %v2047_v16  ;;  %v1501_v26 = vpop.f32.mrf.mxu0 }
 0x1c4   : > { %v2039_v17 = vadd.f32 %v1983_v12, %v1720_v15  ;;  %v2206_v51 = vsel %vm2142_vm2, %v2110_v59, %v2174_v46  ;;  %v1727_v40 = vadd.f32 %v1726_v0, %v1501_v26 }
 0x1c5   : > { %2352 = vrot.lane.b32.xlu1 %v2206_v51, %s2990_s23  ;;  %v2119_v28 = vadd.f32 %v3856_v30, %v2083_v41  ;;  %v2329_v44 = vpop.permute.xlu1 %2328  ;;  %v2233_v51 = vld [vmem:[%s3044_s22 + $0x40] sm:$0xff] }
 0x1c6   : > { %v2075_v10 = vmul.f32 %v3851_v31, %v2039_v17  ;;  %2422 = vst.msk [vmem:[%s3921_s24 + $0x18] sm:$0xff] %vm2418_vm14, %v2329_v44 }
 0x1c7   : > { %vm2151_vm5 = vcmp.ge.f32.partialorder %v2119_v28, 0.0  ;;  %v2183_v53 = vmul.f32 0.01, %v2119_v28  ;;  %2266 = vst.msk [vmem:[%s3921_s24 + $0x40] sm:$0xff] %vm2257_vm11, %v2233_v51 }
 0x1c8   : > { %v2111_v29 = vadd.f32 %v3856_v30, %v2075_v10  ;;  %v2005_v25 = vpop.f32.mrf.mxu3 }
 0x1c9   : > { %v2048_v63 = vadd.f32 %v2005_v25, %v1742_v13  ;;  %v2215_v27 = vsel %vm2151_vm5, %v2119_v28, %v2183_v53 }
 0x1ca   : > { %vm2143_vm7 = vcmp.ge.f32.partialorder %v2111_v29, 0.0  ;;  %v2175_v33 = vmul.f32 0.01, %v2111_v29 }
 0x1cb   : > { %v1985_v22 = vpop.f32.mrf.mxu2  ;;  %v2084_v50 = vmul.f32 %v3851_v31, %v2048_v63  ;;  %v1504_v9 = vpop.f32.mrf.mxu0 }
 0x1cc   : > { %v2040_v19 = vadd.f32 %v1985_v22, %v1722_v37  ;;  %v2207_v49 = vsel %vm2143_vm7, %v2111_v29, %v2175_v33  ;;  %v1730_v44 = vadd.f32 %v1729_v56, %v1504_v9  ;;  %v1731_v63 = vpop.f32.mrf.mxu1  ;;  %v2234_v22 = vld [vmem:[%s3044_s22 + $0x48] sm:$0xff] }
 0x1cd   : > { %2354 = vrot.lane.b32.xlu2 %v2207_v49, %s2990_s23  ;;  %2370 = vrot.lane.b32.xlu1 %v2215_v27, %s2990_s23  ;;  %v2120_v60 = vadd.f32 %v3856_v30, %v2084_v50  ;;  %2267 = vst.msk [vmem:[%s3921_s24 + $0x48] sm:$0xff] %vm2257_vm11, %v2234_v22 }
 0x1ce   : > { %v2076_v2 = vmul.f32 %v3851_v31, %v2040_v19 }
 0x1cf   : > { %vm2152_vm8 = vcmp.ge.f32.partialorder %v2120_v60, 0.0  ;;  %v2184_v34 = vmul.f32 0.01, %v2120_v60 }
 0x1d0   : > { %v2112_v52 = vadd.f32 %v3856_v30, %v2076_v2  ;;  %v2008_v47 = vpop.f32.mrf.mxu3 }
 0x1d1   : > { %v2049_v54 = vadd.f32 %v2008_v47, %v1745_v39  ;;  %v2216_v55 = vsel %vm2152_vm8, %v2120_v60, %v2184_v34 }
 0x1d2   : > { %vm2144_vm9 = vcmp.ge.f32.partialorder %v2112_v52, 0.0  ;;  %v2176_v32 = vmul.f32 0.01, %v2112_v52 }
 0x1d3   : > { %v1988_v20 = vpop.f32.mrf.mxu2  ;;  %v2085_v7 = vmul.f32 %v3851_v31, %v2049_v54  ;;  %v1506_v13 = vpop.f32.mrf.mxu0  ;;  %v2238_v54 = vld [vmem:[%s3044_s22 + $0x68] sm:$0xff] }
 0x1d4   : > { %v2041_v45 = vadd.f32 %v1988_v20, %v1725_v38  ;;  %v2208_v35 = vsel %vm2144_vm9, %v2112_v52, %v2176_v32  ;;  %v2337_v18 = vpop.permute.xlu2 %2336  ;;  %v1732_v60 = vadd.f32 %v1731_v63, %v1506_v13  ;;  %2271 = vst.msk [vmem:[%s3921_s24 + $0x68] sm:$0xff] %vm2257_vm11, %v2238_v54  ;;  %v1755_v20 = vadd.f32 %v3978_v3, %v3913_v11  ;;  %v2241_v13 = vld [vmem:[%s3044_s22 + $0x80] sm:$0xff]  ;;  %v2252_v54 = vld [vmem:[%s3044_s22 + $0xd8] sm:$0xff] }
 0x1d5   : > { %2372 = vrot.lane.b32.xlu2 %v2216_v55, %s2990_s23  ;;  %2356 = vrot.lane.b32.xlu0 %v2208_v35, %s2990_s23  ;;  %v2121_v57 = vadd.f32 %v3856_v30, %v2085_v7  ;;  %2426 = vst.msk [vmem:[%s3921_s24 + $0x38] sm:$0xff] %vm2418_vm14, %v2337_v18  ;;  %v2333_v42 = vpop.permute.xlu0 %2332  ;;  %v1734_v55 = vpop.f32.mrf.mxu1  ;;  %v2236_v7 = vld [vmem:[%s3044_s22 + $0x58] sm:$0xff] }
 0x1d6   : > { %v2077_v24 = vmul.f32 %v3851_v31, %v2041_v45  ;;  %2424 = vst.msk [vmem:[%s3921_s24 + $0x28] sm:$0xff] %vm2418_vm14, %v2333_v42 }
 0x1d7   : > { %vm2153_vm10 = vcmp.ge.f32.partialorder %v2121_v57, 0.0  ;;  %v2185_v21 = vmul.f32 0.01, %v2121_v57  ;;  %2269 = vst.msk [vmem:[%s3921_s24 + $0x58] sm:$0xff] %vm2257_vm11, %v2236_v7  ;;  %v2246_v7 = vld [vmem:[%s3044_s22 + $0xa8] sm:$0xff] }
 0x1d8   : > { %v2113_v48 = vadd.f32 %v3856_v30, %v2077_v24  ;;  %v2010_v59 = vpop.f32.mrf.mxu3  ;;  %2274 = vst.msk [vmem:[%s3921_s24 + $0x80] sm:$0xff] %vm2257_vm11, %v2241_v13 }
 0x1d9   : > { %v2050_v15 = vadd.f32 %v2010_v59, %v1747_v8  ;;  %v2217_v46 = vsel %vm2153_vm10, %v2121_v57, %v2185_v21  ;;  %2285 = vst.msk [vmem:[%s3921_s24 + $0xd8] sm:$0xff] %vm2257_vm11, %v2252_v54 }
 0x1da   : > { %vm2145_vm12 = vcmp.ge.f32.partialorder %v2113_v48, 0.0  ;;  %v2177_v16 = vmul.f32 0.01, %v2113_v48  ;;  %2279 = vst.msk [vmem:[%s3921_s24 + $0xa8] sm:$0xff] %vm2257_vm11, %v2246_v7 }
 0x1db   : > { %v1990_v12 = vpop.f32.mrf.mxu2  ;;  %v2086_v23 = vmul.f32 %v3851_v31, %v2050_v15  ;;  %v1509_v34 = vpop.f32.mrf.mxu0 }
 0x1dc   : > { %v2042_v6 = vadd.f32 %v1990_v12, %v1727_v40  ;;  %v2209_v43 = vsel %vm2145_vm12, %v2113_v48, %v2177_v16  ;;  %v1735_v18 = vadd.f32 %v1734_v55, %v1509_v34  ;;  %v1757_v40 = vadd.f32 %v3989_v36, %v3929_v5  ;;  %v2237_v16 = vld [vmem:[%s3044_s22 + $0x60] sm:$0xff]  ;;  %v2251_v34 = vld [vmem:[%s3044_s22 + $0xd0] sm:$0xff]  ;;  %v2256_v55 = vld [vmem:[%s3044_s22 + $0xf8] sm:$0xff] }
 0x1dd   : > { %2358 = vrot.lane.b32.xlu1 %v2209_v43, %s2990_s23  ;;  %2374 = vrot.lane.b32.xlu0 %v2217_v46, %s2990_s23  ;;  %v2122_v41 = vadd.f32 %v3856_v30, %v2086_v23  ;;  %v1736_v59 = vpop.f32.mrf.mxu1  ;;  %2270 = vst.msk [vmem:[%s3921_s24 + $0x60] sm:$0xff] %vm2257_vm11, %v2237_v16 }
 0x1de   : > { %v2078_v17 = vmul.f32 %v3851_v31, %v2042_v6  ;;  %2284 = vst.msk [vmem:[%s3921_s24 + $0xd0] sm:$0xff] %vm2257_vm11, %v2251_v34 }
 0x1df   : > { %vm2154_vm13 = vcmp.ge.f32.partialorder %v2122_v41, 0.0  ;;  %v2186_v28 = vmul.f32 0.01, %v2122_v41  ;;  %2289 = vst.msk [vmem:[%s3921_s24 + $0xf8] sm:$0xff] %vm2257_vm11, %v2256_v55 }
 0x1e0   : > { %v2114_v10 = vadd.f32 %v3856_v30, %v2078_v17  ;;  %v2013_v61 = vpop.f32.mrf.mxu3 }
 0x1e1   : > { %v2051_v29 = vadd.f32 %v2013_v61, %v1750_v58  ;;  %v2218_v37 = vsel %vm2154_vm13, %v2122_v41, %v2186_v28 }
 0x1e2   : > { %vm2146_vm15 = vcmp.ge.f32.partialorder %v2114_v10, 0.0  ;;  %v2178_v53 = vmul.f32 0.01, %v2114_v10 }
 0x1e3   : > { %v1993_v25 = vpop.f32.mrf.mxu2  ;;  %v2087_v27 = vmul.f32 %v3851_v31, %v2051_v29  ;;  %v1511_v11 = vpop.f32.mrf.mxu0 }
 0x1e4   : > { %v2043_v33 = vadd.f32 %v1993_v25, %v1730_v44  ;;  %v2210_v14 = vsel %vm2146_vm15, %v2114_v10, %v2178_v53  ;;  %v2335_v4 = vpop.permute.xlu1 %2334  ;;  %v1737_v46 = vadd.f32 %v1736_v59, %v1511_v11  ;;  %v2254_v11 = vld [vmem:[%s3044_s22 + $0xe8] sm:$0xff] }
 0x1e5   : > { %2360 = vrot.lane.b32.xlu2 %v2210_v14, %s2990_s23  ;;  %2376 = vrot.lane.b32.xlu1 %v2218_v37, %s2990_s23  ;;  %v2123_v50 = vadd.f32 %v3856_v30, %v2087_v27  ;;  %2425 = vst.msk [vmem:[%s3921_s24 + $0x30] sm:$0xff] %vm2418_vm14, %v2335_v4  ;;  %v2239_v27 = vld [vmem:[%s3044_s22 + $0x70] sm:$0xff] }
 0x1e6   : > { %v2079_v19 = vmul.f32 %v3851_v31, %v2043_v33  ;;  %v2250_v33 = vld [vmem:[%s3044_s22 + $0xc8] sm:$0xff]  ;;  %2272 = vst.msk [vmem:[%s3921_s24 + $0x70] sm:$0xff] %vm2257_vm11, %v2239_v27  ;;  %v2240_v4 = vld [vmem:[%s3044_s22 + $0x78] sm:$0xff] }
 0x1e7   : > { %vm2155_vm1 = vcmp.ge.f32.partialorder %v2123_v50, 0.0  ;;  %v2187_v26 = vmul.f32 0.01, %v2123_v50  ;;  %2283 = vst.msk [vmem:[%s3921_s24 + $0xc8] sm:$0xff] %vm2257_vm11, %v2250_v33 }
 0x1e8   : > { %v2115_v49 = vadd.f32 %v3856_v30, %v2079_v19  ;;  %v2015_v2 = vpop.f32.mrf.mxu3  ;;  %2273 = vst.msk [vmem:[%s3921_s24 + $0x78] sm:$0xff] %vm2257_vm11, %v2240_v4  ;;  %v2244_v19 = vld [vmem:[%s3044_s22 + $0x98] sm:$0xff] }
 0x1e9   : > { %v2219_v39 = vsel %vm2155_vm1, %v2123_v50, %v2187_v26  ;;  %v2052_v5 = vadd.f32 %v2015_v2, %v3973_v62  ;;  %2277 = vst.msk [vmem:[%s3921_s24 + $0x98] sm:$0xff] %vm2257_vm11, %v2244_v19  ;;  %v2253_v26 = vld [vmem:[%s3044_s22 + $0xe0] sm:$0xff] }
 0x1ea   : > { %vm2147_vm3 = vcmp.ge.f32.partialorder %v2115_v49, 0.0  ;;  %v2179_v0 = vmul.f32 0.01, %v2115_v49  ;;  %2286 = vst.msk [vmem:[%s3921_s24 + $0xe0] sm:$0xff] %vm2257_vm11, %v2253_v26 }
 0x1eb   : > { %v1995_v52 = vpop.f32.mrf.mxu2  ;;  %v2088_v44 = vmul.f32 %v3851_v31, %v2052_v5  ;;  %2287 = vst.msk [vmem:[%s3921_s24 + $0xe8] sm:$0xff] %vm2257_vm11, %v2254_v11 }
 0x1ec   : > { %v2044_v38 = vadd.f32 %v1995_v52, %v1732_v60  ;;  %v2211_v47 = vsel %vm2147_vm3, %v2115_v49, %v2179_v0  ;;  %v2249_v49 = vld [vmem:[%s3044_s22 + $0xc0] sm:$0xff]  ;;  %v2242_v60 = vld [vmem:[%s3044_s22 + $0x88] sm:$0xff] }
 0x1ed   : > { %2378 = vrot.lane.b32.xlu2 %v2219_v39, %s2990_s23  ;;  %2362 = vrot.lane.b32.xlu0 %v2211_v47, %s2990_s23  ;;  %v2124_v37 = vadd.f32 %v3856_v30, %v2088_v44  ;;  %2282 = vst.msk [vmem:[%s3921_s24 + $0xc0] sm:$0xff] %vm2257_vm11, %v2249_v49  ;;  %v2243_v39 = vld [vmem:[%s3044_s22 + $0x90] sm:$0xff] }
 0x1ee   : > { %v2080_v32 = vmul.f32 %v3851_v31, %v2044_v38  ;;  %2275 = vst.msk [vmem:[%s3921_s24 + $0x88] sm:$0xff] %vm2257_vm11, %v2242_v60  ;;  %v2247_v38 = vld [vmem:[%s3044_s22 + $0xb0] sm:$0xff] }
 0x1ef   : > { %v2188_v63 = vmul.f32 0.01, %v2124_v37  ;;  %vm2156_vm7 = vcmp.ge.f32.partialorder %v2124_v37, 0.0  ;;  %2276 = vst.msk [vmem:[%s3921_s24 + $0x90] sm:$0xff] %vm2257_vm11, %v2243_v39 }
 0x1f0   : > { %v2116_v45 = vadd.f32 %v3856_v30, %v2080_v32  ;;  %v2018_v35 = vpop.f32.mrf.mxu3  ;;  %2280 = vst.msk [vmem:[%s3921_s24 + $0xb0] sm:$0xff] %vm2257_vm11, %v2247_v38 }
 0x1f1   : > { %v2053_v24 = vadd.f32 %v2018_v35, %v1755_v20 }
 0x1f2   : > { %vm2148_vm4 = vcmp.ge.f32.partialorder %v2116_v45, 0.0  ;;  %v2180_v57 = vmul.f32 0.01, %v2116_v45 }
 0x1f3   : > { %v1998_v42 = vpop.f32.mrf.mxu2  ;;  %v2089_v8 = vmul.f32 %v3851_v31, %v2053_v24  ;;  %v2255_v24 = vld [vmem:[%s3044_s22 + $0xf0] sm:$0xff] }
 0x1f4   : > { %v2045_v1 = vadd.f32 %v1998_v42, %v1735_v18  ;;  %v2212_v9 = vsel %vm2148_vm4, %v2116_v45, %v2180_v57  ;;  %v2245_v45 = vld [vmem:[%s3044_s22 + $0xa0] sm:$0xff]  ;;  %2288 = vst.msk [vmem:[%s3921_s24 + $0xf0] sm:$0xff] %vm2257_vm11, %v2255_v24 }
 0x1f5   : > { %2364 = vrot.lane.b32.xlu1 %v2212_v9, %s2990_s23  ;;  %v2125_v48 = vadd.f32 %v3856_v30, %v2089_v8  ;;  %2278 = vst.msk [vmem:[%s3921_s24 + $0xa0] sm:$0xff] %vm2257_vm11, %v2245_v45 }
 0x1f6   : > { %v2081_v3 = vmul.f32 %v3851_v31, %v2045_v1  ;;  %v2248_v1 = vld [vmem:[%s3044_s22 + $0xb8] sm:$0xff] }
 0x1f7   : > { %v2343_v21 = vpop.permute.xlu2 %2342  ;;  %vm2157_vm6 = vcmp.ge.f32.partialorder %v2125_v48, 0.0  ;;  %v2189_v15 = vmul.f32 0.01, %v2125_v48  ;;  %2281 = vst.msk [vmem:[%s3921_s24 + $0xb8] sm:$0xff] %vm2257_vm11, %v2248_v1 }
 0x1f8   : > { %v2117_v56 = vadd.f32 %v3856_v30, %v2081_v3  ;;  %2429 = vst.msk [vmem:[%s3921_s24 + $0x50] sm:$0xff] %vm2418_vm14, %v2343_v21  ;;  %v2020_v12 = vpop.f32.mrf.mxu3 }
 0x1f9   : > { %v2054_v6 = vadd.f32 %v2020_v12, %v1757_v40  ;;  %v2221_v43 = vsel %vm2157_vm6, %v2125_v48, %v2189_v15 }
 0x1fa   : > { %vm2149_vm0 = vcmp.ge.f32.partialorder %v2117_v56, 0.0  ;;  %v2181_v23 = vmul.f32 0.01, %v2117_v56 }
 0x1fb   : > { %v2000_v17 = vpop.f32.mrf.mxu2  ;;  %v2090_v41 = vmul.f32 %v3851_v31, %v2054_v6 }
 0x1fc   : > { %v2046_v36 = vadd.f32 %v2000_v17, %v1737_v46  ;;  %v2213_v51 = vsel %vm2149_vm0, %v2117_v56, %v2181_v23 }
 0x1fd   : > { %2366 = vrot.lane.b32.xlu2 %v2213_v51, %s2990_s23  ;;  %2382 = vrot.lane.b32.xlu1 %v2221_v43, %s2990_s23  ;;  %v2126_v10 = vadd.f32 %v3856_v30, %v2090_v41 }
 0x1fe   : > { %v2082_v58 = vmul.f32 %v3851_v31, %v2046_v36 }
 0x1ff   : > { %v2339_v28 = vpop.permute.xlu0 %2338  ;;  %vm2158_vm2 = vcmp.ge.f32.partialorder %v2126_v10, 0.0  ;;  %v2190_v62 = vmul.f32 0.01, %v2126_v10 }
 0x200   : > { %v2118_v61 = vadd.f32 %v3856_v30, %v2082_v58  ;;  %2427 = vst.msk [vmem:[%s3921_s24 + $0x40] sm:$0xff] %vm2418_vm14, %v2339_v28  ;;  %v2220_v30 = vsel %vm2156_vm7, %v2124_v37, %v2188_v63 }
 0x201   : > { %v2222_v29 = vsel %vm2158_vm2, %v2126_v10, %v2190_v62 }
 0x202   : > { %vm2150_vm5 = vcmp.ge.f32.partialorder %v2118_v61, 0.0  ;;  %v2182_v53 = vmul.f32 0.01, %v2118_v61 }
 0x204   : > { %v2214_v31 = vsel %vm2150_vm5, %v2118_v61, %v2182_v53 }
 0x205   : > { %2384 = vrot.lane.b32.xlu2 %v2222_v29, %s2990_s23  ;;  %2368 = vrot.lane.b32.xlu0 %v2214_v31, %s2990_s23 }
 0x207   : > { %v2341_v25 = vpop.permute.xlu1 %2340 }
 0x208   : > { %2428 = vst.msk [vmem:[%s3921_s24 + $0x48] sm:$0xff] %vm2418_vm14, %v2341_v25 }
 0x20d   : > { %2380 = vrot.lane.b32.xlu0 %v2220_v30, %s2990_s23 }
 0x20f   : > { %v2349_v14 = vpop.permute.xlu2 %2348 }
 0x210   : > { %2432 = vst.msk [vmem:[%s3921_s24 + $0x68] sm:$0xff] %vm2418_vm14, %v2349_v14 }
 0x217   : > { %v2345_v22 = vpop.permute.xlu0 %2344 }
 0x218   : > { %2430 = vst.msk [vmem:[%s3921_s24 + $0x58] sm:$0xff] %vm2418_vm14, %v2345_v22 }
 0x21f   : > { %v2347_v50 = vpop.permute.xlu1 %2346 }
 0x220   : > { %2431 = vst.msk [vmem:[%s3921_s24 + $0x60] sm:$0xff] %vm2418_vm14, %v2347_v50 }
 0x227   : > { %v2355_v2 = vpop.permute.xlu2 %2354 }
 0x228   : > { %2435 = vst.msk [vmem:[%s3921_s24 + $0x80] sm:$0xff] %vm2418_vm14, %v2355_v2 }
 0x22f   : > { %v2373_v0 = vpop.permute.xlu2 %2372  ;;  %v2351_v52 = vpop.permute.xlu0 %2350 }
 0x230   : > { %2444 = vst.msk [vmem:[%s3921_s24 + $0xc8] sm:$0xff] %vm2418_vm14, %v2373_v0 }
 0x231   : > { %2433 = vst.msk [vmem:[%s3921_s24 + $0x70] sm:$0xff] %vm2418_vm14, %v2351_v52 }
 0x237   : > { %v2353_v47 = vpop.permute.xlu1 %2352 }
 0x238   : > { %2434 = vst.msk [vmem:[%s3921_s24 + $0x78] sm:$0xff] %vm2418_vm14, %v2353_v47 }
 0x23f   : > { %v2361_v32 = vpop.permute.xlu2 %2360  ;;  %v2371_v20 = vpop.permute.xlu1 %2370 }
 0x240   : > { %2438 = vst.msk [vmem:[%s3921_s24 + $0x98] sm:$0xff] %vm2418_vm14, %v2361_v32 }
 0x241   : > { %2443 = vst.msk [vmem:[%s3921_s24 + $0xc0] sm:$0xff] %vm2418_vm14, %v2371_v20 }
 0x247   : > { %v2379_v35 = vpop.permute.xlu2 %2378  ;;  %v2357_v18 = vpop.permute.xlu0 %2356 }
 0x248   : > { %2447 = vst.msk [vmem:[%s3921_s24 + $0xe0] sm:$0xff] %vm2418_vm14, %v2379_v35 }
 0x249   : > { %2436 = vst.msk [vmem:[%s3921_s24 + $0x88] sm:$0xff] %vm2418_vm14, %v2357_v18 }
 0x24f   : > { %v2359_v57 = vpop.permute.xlu1 %2358  ;;  %v2375_v42 = vpop.permute.xlu0 %2374 }
 0x250   : > { %2437 = vst.msk [vmem:[%s3921_s24 + $0x90] sm:$0xff] %vm2418_vm14, %v2359_v57 }
 0x251   : > { %2445 = vst.msk [vmem:[%s3921_s24 + $0xd0] sm:$0xff] %vm2418_vm14, %v2375_v42 }
 0x257   : > { %v2367_v8 = vpop.permute.xlu2 %2366  ;;  %v2377_v9 = vpop.permute.xlu1 %2376 }
 0x258   : > { %2441 = vst.msk [vmem:[%s3921_s24 + $0xb0] sm:$0xff] %vm2418_vm14, %v2367_v8 }
 0x259   : > { %2446 = vst.msk [vmem:[%s3921_s24 + $0xd8] sm:$0xff] %vm2418_vm14, %v2377_v9 }
 0x25f   : > { %v2385_v3 = vpop.permute.xlu2 %2384  ;;  %v2363_v48 = vpop.permute.xlu0 %2362 }
 0x260   : > { %2450 = vst.msk [vmem:[%s3921_s24 + $0xf8] sm:$0xff] %vm2418_vm14, %v2385_v3 }
 0x261   : > { %2439 = vst.msk [vmem:[%s3921_s24 + $0xa0] sm:$0xff] %vm2418_vm14, %v2363_v48 }
 0x267   : > { %v2365_v21 = vpop.permute.xlu1 %2364 }
 0x268   : > { %2440 = vst.msk [vmem:[%s3921_s24 + $0xa8] sm:$0xff] %vm2418_vm14, %v2365_v21 }
 0x26f   : > { %v2383_v40 = vpop.permute.xlu1 %2382 }
 0x270   : > { %2449 = vst.msk [vmem:[%s3921_s24 + $0xf0] sm:$0xff] %vm2418_vm14, %v2383_v40 }
 0x277   : > { %v2369_v59 = vpop.permute.xlu0 %2368 }
 0x278   : > { %2442 = vst.msk [vmem:[%s3921_s24 + $0xb8] sm:$0xff] %vm2418_vm14, %v2369_v59 }
 0x27f   : > { %v2381_v56 = vpop.permute.xlu0 %2380 }
 0x280   : > { %2448 = vst.msk [vmem:[%s3921_s24 + $0xe8] sm:$0xff] %vm2418_vm14, %v2381_v56 }
 0x281 PF: > { %s14_s17 = sadd.s32 1, %s2988_s17   ;;  %s4219_s15 = smov %s2984_s16 }
 0x282   : > { %p11_p5 = scmp.ge.s32.totalorder %s14_s17, 4   ;;  %s4220_s16 = smov %s4222_s18 }
 0x284   :  { %13 = sbr.rel (!%p11_p5) target bundleno = 2 (0x2), region = 78 }

</bundles_post_ra>
